<compile_context>
chip_gen: v6e
topology: v6e:2x2x1
jax: 0.10.0
libtpu: 0.0.40
codegen_flags: <defaults>
</compile_context>

<pallas_src>
import functools

import jax
import jax.numpy as jnp
from jax import lax
from jax.experimental import pallas as pl
from jax.experimental.pallas import tpu as pltpu

EPS = 1e-5  # nn.LayerNorm default eps


def _round_up(x, m):
    return (x + m - 1) // m * m


def _padded_tokens(n):
    """Pad token count to a multiple of 8 (sublane), and of 128 once large."""
    n8 = _round_up(n, 8)
    return n8 if n8 <= 128 else _round_up(n, 128)


# ---------------------------------------------------------------------------
# generation-aware VMEM budget
# ---------------------------------------------------------------------------
def _vmem_limit_bytes():
    # v7x has only 64 MiB VMEM per TensorCore; v5e/v6e have 128 MiB. Use 3/4 of
    # physical capacity so Mosaic keeps headroom for internal scratch.
    try:
        cap = int(pltpu.get_tpu_info().vmem_capacity_bytes)
        return max((cap // 4) * 3, 32 * 1024 * 1024)
    except Exception:  # noqa: BLE001 - conservative, proven-safe default
        return 64 * 1024 * 1024


VMEM_LIMIT = _vmem_limit_bytes()


# ---------------------------------------------------------------------------
# single-buffered weight BlockSpecs (loop-invariant operands)
# ---------------------------------------------------------------------------
_BUFFERED_ONE_OK = None


def _single_buffer_weights_supported():
    """Probe (OUTSIDE jit) whether pipeline_mode=pl.Buffered(1) lowers & runs."""
    global _BUFFERED_ONE_OK
    if _BUFFERED_ONE_OK is not None:
        return _BUFFERED_ONE_OK
    try:
        def _k(x_ref, w_ref, o_ref):
            o_ref[...] = x_ref[...] + w_ref[...]

        f = pl.pallas_call(
            _k,
            grid=(2,),
            in_specs=[
                pl.BlockSpec((8, 128), lambda i: (i, 0)),
                pl.BlockSpec((8, 128), lambda i: (0, 0),
                             pipeline_mode=pl.Buffered(1)),
            ],
            out_specs=pl.BlockSpec((8, 128), lambda i: (i, 0)),
            out_shape=jax.ShapeDtypeStruct((16, 128), jnp.float32),
        )
        jax.block_until_ready(
            f(jnp.zeros((16, 128), jnp.float32), jnp.zeros((8, 128), jnp.float32)))
        _BUFFERED_ONE_OK = True
    except Exception:  # noqa: BLE001 - fall back to default double buffering
        _BUFFERED_ONE_OK = False
    return _BUFFERED_ONE_OK


def _const_spec(shape):
    """Full-array block with a constant index_map (loop-invariant weights).

    The block never changes across the grid, so double buffering only wastes
    VMEM; use a single buffer when the Pallas build supports it.
    """
    index_map = lambda *_: (0,) * len(shape)
    if _single_buffer_weights_supported():
        return pl.BlockSpec(shape, index_map, pipeline_mode=pl.Buffered(1))
    return pl.BlockSpec(shape, index_map)


# ---------------------------------------------------------------------------
# in-kernel helpers
# ---------------------------------------------------------------------------
def _layernorm(x, g, b):
    mu = jnp.mean(x, axis=-1, keepdims=True)
    var = jnp.mean((x - mu) ** 2, axis=-1, keepdims=True)
    return (x - mu) * lax.rsqrt(var + EPS) * g + b


def _gelu(x):
    # TODO(synk): PyTorch nn.GELU() default is the exact erf-based GELU; erf has
    # no guaranteed Mosaic lowering, so we use the tanh approximation (~1e-3 err).
    c = 0.7978845608028654  # sqrt(2/pi)
    return 0.5 * x * (1.0 + jnp.tanh(c * (x + 0.044715 * x * x * x)))


# ---------------------------------------------------------------------------
# Pallas kernels
# ---------------------------------------------------------------------------
def patch_embed_kernel(p_ref, w_ref, b_ref, o_ref):
    # p_ref: (TM, C*p*p) bf16, w_ref: (C*p*p, D) bf16, b_ref: (1, D) f32
    o_ref[...] = (
        jnp.dot(p_ref[...], w_ref[...], preferred_element_type=jnp.float32)
        + b_ref[...]
    ).astype(o_ref.dtype)


def ln_qkv_kernel(x_ref, g_ref, b_ref, w_ref, o_ref):
    # LN1 + QKV projection for one (TM, D) row tile. The 1/dim_head attention
    # scale is already folded into the q columns of w_ref.
    xn = _layernorm(x_ref[...].astype(jnp.float32), g_ref[...], b_ref[...])
    o_ref[...] = jnp.dot(xn.astype(jnp.bfloat16), w_ref[...],
                         preferred_element_type=jnp.float32).astype(o_ref.dtype)


def attn_core_kernel(q_ref, k_ref, v_ref, wo_ref, bo_ref, x_ref, o_ref,
                     acc_ref, *, n_valid):
    # grid = (B, N//TQ, heads); heads is the (last, "arbitrary") reduction axis.
    # q_ref: (TQ, dh), k_ref/v_ref: (N, dh), wo_ref: (dh, D), x_ref: (TQ, D).
    h = pl.program_id(2)

    @pl.when(h == 0)
    def _():
        acc_ref[...] = jnp.zeros_like(acc_ref)

    dots = lax.dot_general(q_ref[...], k_ref[...], (((1,), (1,)), ((), ())),
                           preferred_element_type=jnp.float32)        # (TQ, N)
    n_keys = dots.shape[-1]
    if n_valid < n_keys:
        # broadcast (1, N) key-padding bias (no (N, N) mask materialized)
        col = lax.broadcasted_iota(jnp.int32, (1, n_keys), 1)
        dots = dots + jnp.where(col < n_valid, 0.0, -1e30)
    dots = dots - jnp.max(dots, axis=-1, keepdims=True)
    e = jnp.exp(dots)
    p = e * pl.reciprocal(jnp.sum(e, axis=-1, keepdims=True), approx=True)
    ctx = jnp.dot(p.astype(jnp.bfloat16), v_ref[...],
                  preferred_element_type=jnp.float32)                  # (TQ, dh)
    # accumulate this head's output-projection partial (no concatenate)
    acc_ref[...] += jnp.dot(ctx.astype(jnp.bfloat16), wo_ref[...],
                            preferred_element_type=jnp.float32)        # (TQ, D)

    @pl.when(h == pl.num_programs(2) - 1)
    def _():
        o_ref[...] = (x_ref[...].astype(jnp.float32) + acc_ref[...]
                      + bo_ref[...]).astype(o_ref.dtype)


def mlp_block_kernel(x_ref, g_ref, b_ref, w1_ref, b1_ref, w2_ref, b2_ref,
                     o_ref, xn_ref, acc_ref):
    # grid = (B, N//TM, hidden//TH); hidden is the (last, "arbitrary") axis.
    hk = pl.program_id(2)

    @pl.when(hk == 0)
    def _():
        xn = _layernorm(x_ref[...].astype(jnp.float32), g_ref[...], b_ref[...])
        xn_ref[...] = xn.astype(jnp.bfloat16)
        acc_ref[...] = jnp.zeros_like(acc_ref)

    hdn = jnp.dot(xn_ref[...], w1_ref[...],
                  preferred_element_type=jnp.float32) + b1_ref[...]
    hdn = _gelu(hdn)
    acc_ref[...] += jnp.dot(hdn.astype(jnp.bfloat16), w2_ref[...],
                            preferred_element_type=jnp.float32)

    @pl.when(hk == pl.num_programs(2) - 1)
    def _():
        o_ref[...] = (x_ref[...].astype(jnp.float32) + acc_ref[...]
                      + b2_ref[...]).astype(o_ref.dtype)


def head_kernel(c_ref, g_ref, b_ref, w_ref, bh_ref, o_ref):
    xn = _layernorm(c_ref[...].astype(jnp.float32), g_ref[...], b_ref[...])
    o_ref[...] = (jnp.dot(xn.astype(jnp.bfloat16), w_ref[...],
                          preferred_element_type=jnp.float32) + bh_ref[...])


# ---------------------------------------------------------------------------
# wrappers (glue: reshapes / pallas_call setup)
# ---------------------------------------------------------------------------
def _pick_row_tile(n_rows, cap=256):
    """Pick a sublane-aligned row tile; prefer one that divides n_rows so the
    wrapper never needs a jnp.pad copy."""
    cap = min(cap, _round_up(n_rows, 8))
    if cap < 64:
        return cap, _round_up(n_rows, cap)
    for tm in range(cap, 63, -8):
        if n_rows % tm == 0:
            return tm, n_rows
    return cap, _round_up(n_rows, cap)


def _pick_hidden_tile(hidden, cap=2048):
    if hidden <= cap:
        return hidden
    for th in range(cap, 127, -128):
        if hidden % th == 0:
            return th
    return hidden


def patch_embed(x, w, b, patch_size):
    # x: (B, C, H, W) NCHW. Conv(stride=kernel=p) == per-patch flatten + matmul.
    B, C, H, W = x.shape
    p = patch_size
    nh, nw = H // p, W // p
    # cast to bf16 BEFORE the layout passes -> halves the wrapper HBM traffic
    xb = x.astype(jnp.bfloat16)
    # (B,C,nh,p,nw,p) -> (B,nh,nw,C,p,p) -> (B*nh*nw, C*p*p); flatten order
    # (c, kh, kw) matches conv weight.reshape(D, -1).
    patches = (
        xb.reshape(B, C, nh, p, nw, p)
        .transpose(0, 2, 4, 1, 3, 5)
        .reshape(B * nh * nw, C * p * p)
    )
    R, Cpp = patches.shape
    D = w.shape[1]

    tm, R_pad = _pick_row_tile(R)
    if R_pad != R:
        patches = jnp.pad(patches, ((0, R_pad - R), (0, 0)))

    out = pl.pallas_call(
        patch_embed_kernel,
        grid=(R_pad // tm,),
        in_specs=[
            pl.BlockSpec((tm, Cpp), lambda i: (i, 0)),
            _const_spec(w.shape),
            _const_spec(b.shape),
        ],
        out_specs=pl.BlockSpec((tm, D), lambda i: (i, 0)),
        out_shape=jax.ShapeDtypeStruct((R_pad, D), jnp.bfloat16),
        compiler_params=pltpu.CompilerParams(
            dimension_semantics=("parallel",),
            vmem_limit_bytes=VMEM_LIMIT),
    )(patches, w, b)
    return out[:R].reshape(B, nh * nw, D)


def attention_block(x, attn_params, heads, n_valid, row_tile):
    ln1g, ln1b, wqkv, wo, bo = attn_params
    B, N, D = x.shape
    dh = D // heads

    # 1) LN1 + QKV projection, row-tiled -> B * (N//TM) parallel grid steps.
    qkv = pl.pallas_call(
        ln_qkv_kernel,
        grid=(B, N // row_tile),
        in_specs=[
            pl.BlockSpec((pl.Squeezed(), row_tile, D), lambda b, r: (b, r, 0)),
            _const_spec(ln1g.shape),
            _const_spec(ln1b.shape),
            _const_spec(wqkv.shape),
        ],
        out_specs=pl.BlockSpec((pl.Squeezed(), row_tile, 3 * D),
                               lambda b, r: (b, r, 0)),
        out_shape=jax.ShapeDtypeStruct((B, N, 3 * D), jnp.bfloat16),
        compiler_params=pltpu.CompilerParams(
            dimension_semantics=("parallel", "parallel"),
            vmem_limit_bytes=VMEM_LIMIT),
    )(x, ln1g, ln1b, wqkv)

    # 2) wrapper-side layout plumbing: head-major q/k/v so the attention core
    #    never lane-slices dh-wide columns (avoids per-head Mosaic relayouts).
    qkv_h = qkv.reshape(B, N, 3, heads, dh).transpose(2, 0, 3, 1, 4)
    q, k, v = qkv_h[0], qkv_h[1], qkv_h[2]           # each (B, heads, N, dh)

    # 3) attention core on a (B, q-tiles, heads) grid; the heads axis reduces
    #    the per-head output-projection partials into a (TQ, D) scratch.
    out = pl.pallas_call(
        functools.partial(attn_core_kernel, n_valid=n_valid),
        grid=(B, N // row_tile, heads),
        in_specs=[
            pl.BlockSpec((pl.Squeezed(), pl.Squeezed(), row_tile, dh),
                         lambda b, qi, h: (b, h, qi, 0)),
            pl.BlockSpec((pl.Squeezed(), pl.Squeezed(), N, dh),
                         lambda b, qi, h: (b, h, 0, 0)),
            pl.BlockSpec((pl.Squeezed(), pl.Squeezed(), N, dh),
                         lambda b, qi, h: (b, h, 0, 0)),
            pl.BlockSpec((dh, D), lambda b, qi, h: (h, 0)),
            _const_spec(bo.shape),
            pl.BlockSpec((pl.Squeezed(), row_tile, D),
                         lambda b, qi, h: (b, qi, 0)),
        ],
        out_specs=pl.BlockSpec((pl.Squeezed(), row_tile, D),
                               lambda b, qi, h: (b, qi, 0)),
        out_shape=jax.ShapeDtypeStruct((B, N, D), jnp.bfloat16),
        scratch_shapes=[pltpu.VMEM((row_tile, D), jnp.float32)],
        compiler_params=pltpu.CompilerParams(
            dimension_semantics=("parallel", "parallel", "arbitrary"),
            vmem_limit_bytes=VMEM_LIMIT),
    )(q, k, v, wo, bo, x)
    return out


def mlp_block(x, mlp_params, row_tile):
    ln2g, ln2b, w1, b1, w2, b2 = mlp_params
    B, N, D = x.shape
    hidden = w1.shape[1]
    th = _pick_hidden_tile(hidden)       # caps weight residency on v7x VMEM

    return pl.pallas_call(
        mlp_block_kernel,
        grid=(B, N // row_tile, hidden // th),
        in_specs=[
            pl.BlockSpec((pl.Squeezed(), row_tile, D),
                         lambda b, r, hk: (b, r, 0)),
            _const_spec(ln2g.shape),
            _const_spec(ln2b.shape),
            pl.BlockSpec((D, th), lambda b, r, hk: (0, hk)),
            pl.BlockSpec((1, th), lambda b, r, hk: (0, hk)),
            pl.BlockSpec((th, D), lambda b, r, hk: (hk, 0)),
            _const_spec(b2.shape),
        ],
        out_specs=pl.BlockSpec((pl.Squeezed(), row_tile, D),
                               lambda b, r, hk: (b, r, 0)),
        out_shape=jax.ShapeDtypeStruct((B, N, D), jnp.bfloat16),
        scratch_shapes=[pltpu.VMEM((row_tile, D), jnp.bfloat16),
                        pltpu.VMEM((row_tile, D), jnp.float32)],
        compiler_params=pltpu.CompilerParams(
            dimension_semantics=("parallel", "parallel", "arbitrary"),
            vmem_limit_bytes=VMEM_LIMIT),
    )(x, ln2g, ln2b, w1, b1, w2, b2)


def vit_head(cls_tokens, lng, lnb, wh, bh, num_classes):
    B = cls_tokens.shape[0]
    c_pad = wh.shape[1]                  # padded to a multiple of 128 at init
    out = pl.pallas_call(
        head_kernel,
        out_shape=jax.ShapeDtypeStruct((B, c_pad), jnp.float32),
        compiler_params=pltpu.CompilerParams(vmem_limit_bytes=VMEM_LIMIT),
    )(cls_tokens, lng, lnb, wh, bh)
    return out[:, :num_classes]


def vit_forward(x, params, *, patch_size, heads, num_classes):
    tokens = patch_embed(x, params["patch_w"], params["patch_b"], patch_size)
    B, N, D = tokens.shape

    # Pad the token axis to a sublane/lane friendly size; padded keys are masked
    # inside the attention kernel and padded rows are discarded at the end.
    n_pad = _padded_tokens(N)
    if n_pad != N:
        tokens = jnp.pad(tokens, ((0, 0), (0, n_pad - N), (0, 0)))
    # v6e/v7x MXU is 256x256: prefer a 256-row tile when it divides n_pad.
    row_tile = 256 if (n_pad >= 256 and n_pad % 256 == 0) else min(n_pad, 128)

    for blk in params["blocks"]:
        tokens = attention_block(tokens, blk["attn"], heads, N, row_tile)
        tokens = mlp_block(tokens, blk["mlp"], row_tile)

    cls = tokens[:, 0, :]                # matches x[:, 0] in the module
    return vit_head(cls, params["lng"], params["lnb"],
                    params["head_w"], params["head_b"], num_classes)


# ---------------------------------------------------------------------------
# deterministic parameter init (synthetic, matches module shapes)
# ---------------------------------------------------------------------------
def init_params(key, *, img_size, patch_size, in_chans, num_classes,
                dim, depth, heads, mlp_expansion):
    del img_size
    dim_head = dim // heads
    keys = iter(jax.random.split(key, 2 + 4 * depth + 4))

    def dense(k, fan_in, fan_out):
        w = jax.random.normal(k, (fan_in, fan_out), jnp.float32) * 0.02
        b = jnp.zeros((1, fan_out), jnp.float32)
        return w, b

    params = {}
    # nn.Conv2d(in_chans, dim, kernel=patch, stride=patch): weight (dim, C, p, p)
    conv_w = jax.random.normal(
        next(keys), (dim, in_chans, patch_size, patch_size), jnp.float32) * 0.02
    params["patch_w"] = conv_w.reshape(dim, -1).T.astype(jnp.bfloat16)
    params["patch_b"] = jnp.zeros((1, dim), jnp.float32)

    blocks = []
    for _ in range(depth):
        wqkv, _ = dense(next(keys), dim, dim * 3)          # qkv has bias=False
        # Fold the reference module's attention scale into q: the PyTorch spec
        # computes dots / dim_head (NOT / sqrt(dim_head)), so scale by 1/dh.
        wqkv = wqkv.at[:, :dim].multiply(1.0 / dim_head)
        wo, bo = dense(next(keys), dim, dim)
        w1, b1 = dense(next(keys), dim, dim * mlp_expansion)
        w2, b2 = dense(next(keys), dim * mlp_expansion, dim)
        blocks.append({
            "attn": (jnp.ones((1, dim), jnp.float32),      # ln1 gamma
                     jnp.zeros((1, dim), jnp.float32),     # ln1 beta
                     wqkv.astype(jnp.bfloat16),
                     wo.astype(jnp.bfloat16), bo),
            "mlp": (jnp.ones((1, dim), jnp.float32),       # ln2 gamma
                    jnp.zeros((1, dim), jnp.float32),      # ln2 beta
                    w1.astype(jnp.bfloat16), b1,
                    w2.astype(jnp.bfloat16), b2),
        })
    params["blocks"] = blocks

    params["lng"] = jnp.ones((1, dim), jnp.float32)
    params["lnb"] = jnp.zeros((1, dim), jnp.float32)
    # classifier: pad output width to a multiple of 128 (lane-dense stores);
    # the wrapper slices back to num_classes.
    c_pad = _round_up(num_classes, 128)
    wh, _ = dense(next(keys), dim, num_classes)
    params["head_w"] = jnp.pad(
        wh, ((0, 0), (0, c_pad - num_classes))).astype(jnp.bfloat16)
    params["head_b"] = jnp.zeros((1, c_pad), jnp.float32)
    return params


# ---------------------------------------------------------------------------
if __name__ == "__main__":
    # Small, module-consistent shapes.
    B, C, IMG, P = 2, 4, 16, 4          # -> n_patches = (16/4)^2 = 16 tokens
    DIM, DEPTH, HEADS, EXP = 32, 2, 4, 4
    NUM_CLASSES = 10

    # Run the Buffered(1) feature probe eagerly, before any jit tracing.
    _single_buffer_weights_supported()

    key = jax.random.PRNGKey(0)
    xkey, pkey = jax.random.split(key)
    x = jax.random.normal(xkey, (B, C, IMG, IMG), jnp.float32)

    params = init_params(
        pkey, img_size=IMG, patch_size=P, in_chans=C, num_classes=NUM_CLASSES,
        dim=DIM, depth=DEPTH, heads=HEADS, mlp_expansion=EXP,
    )

    fwd = jax.jit(functools.partial(
        vit_forward, patch_size=P, heads=HEADS, num_classes=NUM_CLASSES))
    out = fwd(x, params)
    jax.block_until_ready(out)
    assert out.shape == (B, NUM_CLASSES), out.shape
    print("KERNEL_OK")
</pallas_src>

<mosaic_0001>
module attributes {stable_mosaic.version = 11 : i64} {
  func.func @_k(%arg0: i32, %arg1: memref<8x128xf32, #tpu.memory_space<vmem>>, %arg2: memref<8x128xf32, #tpu.memory_space<vmem>>, %arg3: memref<8x128xf32, #tpu.memory_space<vmem>>) attributes {dimension_semantics = [#tpu.dimension_semantics<arbitrary>], iteration_bounds = array<i64: 2>, scalar_prefetch = 0 : i64, scratch_operands = 0 : i64, tpu.core_type = #tpu.core_type<tc>, window_params = [{transform_indices = @transform_0, window_bounds = array<i64: 8, 128>}, {pipeline_mode = #tpu.pipeline_mode<synchronous>, transform_indices = @transform_1, window_bounds = array<i64: 8, 128>}, {transform_indices = @transform_2, window_bounds = array<i64: 8, 128>}]} {
    %c0 = arith.constant 0 : index
    %c0_0 = arith.constant 0 : index
    %0 = vector.load %arg1[%c0, %c0_0] : memref<8x128xf32, #tpu.memory_space<vmem>>, vector<8x128xf32>
    %c0_1 = arith.constant 0 : index
    %c0_2 = arith.constant 0 : index
    %1 = vector.load %arg2[%c0_1, %c0_2] : memref<8x128xf32, #tpu.memory_space<vmem>>, vector<8x128xf32>
    %2 = arith.addf %0, %1 : vector<8x128xf32>
    %c0_3 = arith.constant 0 : index
    %c0_4 = arith.constant 0 : index
    %3 = vector.load %arg3[%c0_3, %c0_4] : memref<8x128xf32, #tpu.memory_space<vmem>>, vector<8x128xf32>
    tpu.vector_store %arg3[%c0_3, %c0_4], %2 {strides = array<i32>} : memref<8x128xf32, #tpu.memory_space<vmem>>, vector<8x128xf32>,
    return
  }
  func.func @transform_0(%arg0: i32) -> (i32, i32) {
    %c0_i32 = arith.constant 0 : i32
    %c0_i32_0 = arith.constant 0 : i32
    return %arg0, %c0_i32 : i32, i32
  }
  func.func @transform_1(%arg0: i32) -> (i32, i32) {
    %c0_i32 = arith.constant 0 : i32
    %c0_i32_0 = arith.constant 0 : i32
    %c0_i32_1 = arith.constant 0 : i32
    return %c0_i32, %c0_i32_0 : i32, i32
  }
  func.func @transform_2(%arg0: i32) -> (i32, i32) {
    %c0_i32 = arith.constant 0 : i32
    %c0_i32_0 = arith.constant 0 : i32
    return %arg0, %c0_i32 : i32, i32
  }
}

module attributes {stable_mosaic.version = 11 : i64} {
  func.func @patch_embed_kernel(%arg0: i32, %arg1: memref<32x64xbf16, #tpu.memory_space<vmem>>, %arg2: memref<64x32xbf16, #tpu.memory_space<vmem>>, %arg3: memref<1x32xf32, #tpu.memory_space<vmem>>, %arg4: memref<32x32xbf16, #tpu.memory_space<vmem>>) attributes {dimension_semantics = [#tpu.dimension_semantics<parallel>], iteration_bounds = array<i64: 1>, scalar_prefetch = 0 : i64, scratch_operands = 0 : i64, tpu.core_type = #tpu.core_type<tc>, window_params = [{transform_indices = @transform_0, window_bounds = array<i64: 32, 64>}, {pipeline_mode = #tpu.pipeline_mode<synchronous>, transform_indices = @transform_1, window_bounds = array<i64: 64, 32>}, {pipeline_mode = #tpu.pipeline_mode<synchronous>, transform_indices = @transform_2, window_bounds = array<i64: 1, 32>}, {transform_indices = @transform_3, window_bounds = array<i64: 32, 32>}]} {
    %c0 = arith.constant 0 : index
    %c0_0 = arith.constant 0 : index
    %0 = vector.load %arg1[%c0, %c0_0] : memref<32x64xbf16, #tpu.memory_space<vmem>>, vector<32x64xbf16>
    %c0_1 = arith.constant 0 : index
    %c0_2 = arith.constant 0 : index
    %1 = vector.load %arg2[%c0_1, %c0_2] : memref<64x32xbf16, #tpu.memory_space<vmem>>, vector<64x32xbf16>
    %cst = arith.constant dense<0.000000e+00> : vector<32x32xf32>
    %2 = tpu.matmul %0, %1, %cst {dimension_numbers = #tpu.dot_dimension_numbers<[1], [0], [0], [1], [0, 0, 1, 1], [], []>} : vector<32x64xbf16>, vector<64x32xbf16>, vector<32x32xf32> -> vector<32x32xf32>
    %c0_3 = arith.constant 0 : index
    %c0_4 = arith.constant 0 : index
    %3 = vector.load %arg3[%c0_3, %c0_4] : memref<1x32xf32, #tpu.memory_space<vmem>>, vector<1x32xf32>
    %4 = vector.broadcast %3 : vector<1x32xf32> to vector<32x32xf32>
    %5 = arith.addf %2, %4 : vector<32x32xf32>
    %6 = arith.truncf %5 : vector<32x32xf32> to vector<32x32xbf16>
    %c0_5 = arith.constant 0 : index
    %c0_6 = arith.constant 0 : index
    %7 = vector.load %arg4[%c0_5, %c0_6] : memref<32x32xbf16, #tpu.memory_space<vmem>>, vector<32x32xbf16>
    tpu.vector_store %arg4[%c0_5, %c0_6], %6 {strides = array<i32>} : memref<32x32xbf16, #tpu.memory_space<vmem>>, vector<32x32xbf16>,
    return
  }
  func.func @transform_0(%arg0: i32) -> (i32, i32) {
    %c0_i32 = arith.constant 0 : i32
    %c0_i32_0 = arith.constant 0 : i32
    return %arg0, %c0_i32 : i32, i32
  }
  func.func @transform_1(%arg0: i32) -> (i32, i32) {
    %c0_i32 = arith.constant 0 : i32
    %c0_i32_0 = arith.constant 0 : i32
    %c0_i32_1 = arith.constant 0 : i32
    return %c0_i32, %c0_i32_0 : i32, i32
  }
  func.func @transform_2(%arg0: i32) -> (i32, i32) {
    %c0_i32 = arith.constant 0 : i32
    %c0_i32_0 = arith.constant 0 : i32
    %c0_i32_1 = arith.constant 0 : i32
    return %c0_i32, %c0_i32_0 : i32, i32
  }
  func.func @transform_3(%arg0: i32) -> (i32, i32) {
    %c0_i32 = arith.constant 0 : i32
    %c0_i32_0 = arith.constant 0 : i32
    return %arg0, %c0_i32 : i32, i32
  }
}

module attributes {stable_mosaic.version = 11 : i64} {
  func.func @ln_qkv_kernel(%arg0: i32, %arg1: i32, %arg2: memref<1x16x32xbf16, #tpu.memory_space<vmem>>, %arg3: memref<1x32xf32, #tpu.memory_space<vmem>>, %arg4: memref<1x32xf32, #tpu.memory_space<vmem>>, %arg5: memref<32x96xbf16, #tpu.memory_space<vmem>>, %arg6: memref<1x16x96xbf16, #tpu.memory_space<vmem>>) attributes {dimension_semantics = [#tpu.dimension_semantics<parallel>, #tpu.dimension_semantics<parallel>], iteration_bounds = array<i64: 2, 1>, scalar_prefetch = 0 : i64, scratch_operands = 0 : i64, tpu.core_type = #tpu.core_type<tc>, window_params = [{transform_indices = @transform_0, window_bounds = array<i64: 1, 16, 32>}, {pipeline_mode = #tpu.pipeline_mode<synchronous>, transform_indices = @transform_1, window_bounds = array<i64: 1, 32>}, {pipeline_mode = #tpu.pipeline_mode<synchronous>, transform_indices = @transform_2, window_bounds = array<i64: 1, 32>}, {pipeline_mode = #tpu.pipeline_mode<synchronous>, transform_indices = @transform_3, window_bounds = array<i64: 32, 96>}, {transform_indices = @transform_4, window_bounds = array<i64: 1, 16, 96>}]} {
    %c0 = arith.constant 0 : index
    %c0_0 = arith.constant 0 : index
    %c0_1 = arith.constant 0 : index
    %0 = vector.load %arg2[%c0, %c0_0, %c0_1] : memref<1x16x32xbf16, #tpu.memory_space<vmem>>, vector<1x16x32xbf16>
    %1 = vector.shape_cast %0 : vector<1x16x32xbf16> to vector<16x32xbf16>
    %2 = arith.extf %1 : vector<16x32xbf16> to vector<16x32xf32>
    %c0_2 = arith.constant 0 : index
    %c0_3 = arith.constant 0 : index
    %3 = vector.load %arg3[%c0_2, %c0_3] : memref<1x32xf32, #tpu.memory_space<vmem>>, vector<1x32xf32>
    %c0_4 = arith.constant 0 : index
    %c0_5 = arith.constant 0 : index
    %4 = vector.load %arg4[%c0_4, %c0_5] : memref<1x32xf32, #tpu.memory_space<vmem>>, vector<1x32xf32>
    %cst = arith.constant dense<0.000000e+00> : vector<16xf32>
    %5 = vector.multi_reduction <add>, %2, %cst [1] : vector<16x32xf32> to vector<16xf32>
    %6 = vector.shape_cast %5 : vector<16xf32> to vector<16x1xf32>
    %cst_6 = arith.constant 3.200000e+01 : f32
    %7 = vector.broadcast %cst_6 : f32 to vector<16x1xf32>
    %8 = arith.divf %6, %7 : vector<16x1xf32>
    %9 = vector.broadcast %8 : vector<16x1xf32> to vector<16x32xf32>
    %10 = arith.subf %2, %9 : vector<16x32xf32>
    %11 = arith.mulf %10, %10 : vector<16x32xf32>
    %cst_7 = arith.constant dense<0.000000e+00> : vector<16xf32>
    %12 = vector.multi_reduction <add>, %11, %cst_7 [1] : vector<16x32xf32> to vector<16xf32>
    %13 = vector.shape_cast %12 : vector<16xf32> to vector<16x1xf32>
    %cst_8 = arith.constant 3.200000e+01 : f32
    %14 = vector.broadcast %cst_8 : f32 to vector<16x1xf32>
    %15 = arith.divf %13, %14 : vector<16x1xf32>
    %16 = vector.broadcast %8 : vector<16x1xf32> to vector<16x32xf32>
    %17 = arith.subf %2, %16 : vector<16x32xf32>
    %cst_9 = arith.constant 9.99999974E-6 : f32
    %18 = vector.broadcast %cst_9 : f32 to vector<16x1xf32>
    %19 = arith.addf %15, %18 : vector<16x1xf32>
    %20 = math.rsqrt %19 : vector<16x1xf32>
    %21 = vector.broadcast %20 : vector<16x1xf32> to vector<16x32xf32>
    %22 = arith.mulf %17, %21 : vector<16x32xf32>
    %23 = vector.broadcast %3 : vector<1x32xf32> to vector<16x32xf32>
    %24 = arith.mulf %22, %23 : vector<16x32xf32>
    %25 = vector.broadcast %4 : vector<1x32xf32> to vector<16x32xf32>
    %26 = arith.addf %24, %25 : vector<16x32xf32>
    %27 = arith.truncf %26 : vector<16x32xf32> to vector<16x32xbf16>
    %c0_10 = arith.constant 0 : index
    %c0_11 = arith.constant 0 : index
    %28 = vector.load %arg5[%c0_10, %c0_11] : memref<32x96xbf16, #tpu.memory_space<vmem>>, vector<32x96xbf16>
    %cst_12 = arith.constant dense<0.000000e+00> : vector<16x96xf32>
    %29 = tpu.matmul %27, %28, %cst_12 {dimension_numbers = #tpu.dot_dimension_numbers<[1], [0], [0], [1], [0, 0, 1, 1], [], []>} : vector<16x32xbf16>, vector<32x96xbf16>, vector<16x96xf32> -> vector<16x96xf32>
    %30 = arith.truncf %29 : vector<16x96xf32> to vector<16x96xbf16>
    %c0_13 = arith.constant 0 : index
    %c0_14 = arith.constant 0 : index
    %c0_15 = arith.constant 0 : index
    %31 = vector.load %arg6[%c0_13, %c0_14, %c0_15] : memref<1x16x96xbf16, #tpu.memory_space<vmem>>, vector<1x16x96xbf16>
    %32 = vector.shape_cast %31 : vector<1x16x96xbf16> to vector<16x96xbf16>
    %33 = vector.shape_cast %30 : vector<16x96xbf16> to vector<1x16x96xbf16>
    tpu.vector_store %arg6[%c0_13, %c0_14, %c0_15], %33 {strides = array<i32>} : memref<1x16x96xbf16, #tpu.memory_space<vmem>>, vector<1x16x96xbf16>,
    return
  }
  func.func @transform_0(%arg0: i32, %arg1: i32) -> (i32, i32, i32) {
    %c0_i32 = arith.constant 0 : i32
    %c0_i32_0 = arith.constant 0 : i32
    return %arg0, %arg1, %c0_i32 : i32, i32, i32
  }
  func.func @transform_1(%arg0: i32, %arg1: i32) -> (i32, i32) {
    %c0_i32 = arith.constant 0 : i32
    %c0_i32_0 = arith.constant 0 : i32
    %c0_i32_1 = arith.constant 0 : i32
    return %c0_i32, %c0_i32_0 : i32, i32
  }
  func.func @transform_2(%arg0: i32, %arg1: i32) -> (i32, i32) {
    %c0_i32 = arith.constant 0 : i32
    %c0_i32_0 = arith.constant 0 : i32
    %c0_i32_1 = arith.constant 0 : i32
    return %c0_i32, %c0_i32_0 : i32, i32
  }
  func.func @transform_3(%arg0: i32, %arg1: i32) -> (i32, i32) {
    %c0_i32 = arith.constant 0 : i32
    %c0_i32_0 = arith.constant 0 : i32
    %c0_i32_1 = arith.constant 0 : i32
    return %c0_i32, %c0_i32_0 : i32, i32
  }
  func.func @transform_4(%arg0: i32, %arg1: i32) -> (i32, i32, i32) {
    %c0_i32 = arith.constant 0 : i32
    %c0_i32_0 = arith.constant 0 : i32
    return %arg0, %arg1, %c0_i32 : i32, i32, i32
  }
}

module attributes {stable_mosaic.version = 11 : i64} {
  func.func @attn_core_kernel(%arg0: i32, %arg1: i32, %arg2: i32, %arg3: memref<1x1x16x8xbf16, #tpu.memory_space<vmem>>, %arg4: memref<1x1x16x8xbf16, #tpu.memory_space<vmem>>, %arg5: memref<1x1x16x8xbf16, #tpu.memory_space<vmem>>, %arg6: memref<8x32xbf16, #tpu.memory_space<vmem>>, %arg7: memref<1x32xf32, #tpu.memory_space<vmem>>, %arg8: memref<1x16x32xbf16, #tpu.memory_space<vmem>>, %arg9: memref<1x16x32xbf16, #tpu.memory_space<vmem>>, %arg10: memref<16x32xf32, #tpu.memory_space<vmem>>) attributes {dimension_semantics = [#tpu.dimension_semantics<parallel>, #tpu.dimension_semantics<parallel>, #tpu.dimension_semantics<arbitrary>], iteration_bounds = array<i64: 2, 1, 4>, scalar_prefetch = 0 : i64, scratch_operands = 1 : i64, tpu.core_type = #tpu.core_type<tc>, window_params = [{transform_indices = @transform_0, window_bounds = array<i64: 1, 1, 16, 8>}, {transform_indices = @transform_1, window_bounds = array<i64: 1, 1, 16, 8>}, {transform_indices = @transform_2, window_bounds = array<i64: 1, 1, 16, 8>}, {transform_indices = @transform_3, window_bounds = array<i64: 8, 32>}, {pipeline_mode = #tpu.pipeline_mode<synchronous>, transform_indices = @transform_4, window_bounds = array<i64: 1, 32>}, {transform_indices = @transform_5, window_bounds = array<i64: 1, 16, 32>}, {transform_indices = @transform_6, window_bounds = array<i64: 1, 16, 32>}]} {
    %c0_i32 = arith.constant 0 : i32
    %0 = arith.cmpi eq, %arg2, %c0_i32 : i32
    %1 = arith.extui %0 : i1 to i32
    %c0_i32_0 = arith.constant 0 : i32
    %2 = arith.cmpi ne, %1, %c0_i32_0 : i32
    scf.if %2 {
      %cst_23 = arith.constant 0.000000e+00 : f32
      %31 = vector.broadcast %cst_23 : f32 to vector<16x32xf32>
      %c0_24 = arith.constant 0 : index
      %c0_25 = arith.constant 0 : index
      %32 = vector.load %arg10[%c0_24, %c0_25] : memref<16x32xf32, #tpu.memory_space<vmem>>, vector<16x32xf32>
      tpu.vector_store %arg10[%c0_24, %c0_25], %31 {strides = array<i32>} : memref<16x32xf32, #tpu.memory_space<vmem>>, vector<16x32xf32>,
    } else {
    }
    %c0 = arith.constant 0 : index
    %c0_1 = arith.constant 0 : index
    %c0_2 = arith.constant 0 : index
    %c0_3 = arith.constant 0 : index
    %3 = vector.load %arg3[%c0, %c0_1, %c0_2, %c0_3] : memref<1x1x16x8xbf16, #tpu.memory_space<vmem>>, vector<1x1x16x8xbf16>
    %4 = vector.shape_cast %3 : vector<1x1x16x8xbf16> to vector<16x8xbf16>
    %c0_4 = arith.constant 0 : index
    %c0_5 = arith.constant 0 : index
    %c0_6 = arith.constant 0 : index
    %c0_7 = arith.constant 0 : index
    %5 = vector.load %arg4[%c0_4, %c0_5, %c0_6, %c0_7] : memref<1x1x16x8xbf16, #tpu.memory_space<vmem>>, vector<1x1x16x8xbf16>
    %6 = vector.shape_cast %5 : vector<1x1x16x8xbf16> to vector<16x8xbf16>
    %cst = arith.constant dense<0.000000e+00> : vector<16x16xf32>
    %7 = tpu.matmul %4, %6, %cst {dimension_numbers = #tpu.dot_dimension_numbers<[1], [1], [0], [0], [0, 0, 1, 0], [], []>} : vector<16x8xbf16>, vector<16x8xbf16>, vector<16x16xf32> -> vector<16x16xf32>
    %cst_8 = arith.constant dense<0xFF800000> : vector<16xf32>
    %8 = vector.multi_reduction <maximumf>, %7, %cst_8 [1] : vector<16x16xf32> to vector<16xf32>
    %9 = vector.shape_cast %8 : vector<16xf32> to vector<16x1xf32>
    %10 = vector.broadcast %9 : vector<16x1xf32> to vector<16x16xf32>
    %11 = arith.subf %7, %10 : vector<16x16xf32>
    %12 = math.exp %11 : vector<16x16xf32>
    %cst_9 = arith.constant dense<0.000000e+00> : vector<16xf32>
    %13 = vector.multi_reduction <add>, %12, %cst_9 [1] : vector<16x16xf32> to vector<16xf32>
    %14 = vector.shape_cast %13 : vector<16xf32> to vector<16x1xf32>
    %15 = tpu.reciprocal %14 {approx = true} : vector<16x1xf32> -> vector<16x1xf32>
    %16 = vector.broadcast %15 : vector<16x1xf32> to vector<16x16xf32>
    %17 = arith.mulf %12, %16 : vector<16x16xf32>
    %18 = arith.truncf %17 : vector<16x16xf32> to vector<16x16xbf16>
    %c0_10 = arith.constant 0 : index
    %c0_11 = arith.constant 0 : index
    %c0_12 = arith.constant 0 : index
    %c0_13 = arith.constant 0 : index
    %19 = vector.load %arg5[%c0_10, %c0_11, %c0_12, %c0_13] : memref<1x1x16x8xbf16, #tpu.memory_space<vmem>>, vector<1x1x16x8xbf16>
    %20 = vector.shape_cast %19 : vector<1x1x16x8xbf16> to vector<16x8xbf16>
    %cst_14 = arith.constant dense<0.000000e+00> : vector<16x8xf32>
    %21 = tpu.matmul %18, %20, %cst_14 {dimension_numbers = #tpu.dot_dimension_numbers<[1], [0], [0], [1], [0, 0, 1, 1], [], []>} : vector<16x16xbf16>, vector<16x8xbf16>, vector<16x8xf32> -> vector<16x8xf32>
    %c0_15 = arith.constant 0 : index
    %c0_16 = arith.constant 0 : index
    %22 = vector.load %arg10[%c0_15, %c0_16] : memref<16x32xf32, #tpu.memory_space<vmem>>, vector<16x32xf32>
    %23 = arith.truncf %21 : vector<16x8xf32> to vector<16x8xbf16>
    %c0_17 = arith.constant 0 : index
    %c0_18 = arith.constant 0 : index
    %24 = vector.load %arg6[%c0_17, %c0_18] : memref<8x32xbf16, #tpu.memory_space<vmem>>, vector<8x32xbf16>
    %cst_19 = arith.constant dense<0.000000e+00> : vector<16x32xf32>
    %25 = tpu.matmul %23, %24, %cst_19 {dimension_numbers = #tpu.dot_dimension_numbers<[1], [0], [0], [1], [0, 0, 1, 1], [], []>} : vector<16x8xbf16>, vector<8x32xbf16>, vector<16x32xf32> -> vector<16x32xf32>
    %26 = arith.addf %22, %25 : vector<16x32xf32>
    %c0_20 = arith.constant 0 : index
    %c0_21 = arith.constant 0 : index
    %27 = vector.load %arg10[%c0_20, %c0_21] : memref<16x32xf32, #tpu.memory_space<vmem>>, vector<16x32xf32>
    tpu.vector_store %arg10[%c0_20, %c0_21], %26 {strides = array<i32>} : memref<16x32xf32, #tpu.memory_space<vmem>>, vector<16x32xf32>,
    %c3_i32 = arith.constant 3 : i32
    %28 = arith.cmpi eq, %arg2, %c3_i32 : i32
    %29 = arith.extui %28 : i1 to i32
    %c0_i32_22 = arith.constant 0 : i32
    %30 = arith.cmpi ne, %29, %c0_i32_22 : i32
    scf.if %30 {
      %c0_23 = arith.constant 0 : index
      %c0_24 = arith.constant 0 : index
      %c0_25 = arith.constant 0 : index
      %31 = vector.load %arg8[%c0_23, %c0_24, %c0_25] : memref<1x16x32xbf16, #tpu.memory_space<vmem>>, vector<1x16x32xbf16>
      %32 = vector.shape_cast %31 : vector<1x16x32xbf16> to vector<16x32xbf16>
      %33 = arith.extf %32 : vector<16x32xbf16> to vector<16x32xf32>
      %c0_26 = arith.constant 0 : index
      %c0_27 = arith.constant 0 : index
      %34 = vector.load %arg10[%c0_26, %c0_27] : memref<16x32xf32, #tpu.memory_space<vmem>>, vector<16x32xf32>
      %35 = arith.addf %33, %34 : vector<16x32xf32>
      %c0_28 = arith.constant 0 : index
      %c0_29 = arith.constant 0 : index
      %36 = vector.load %arg7[%c0_28, %c0_29] : memref<1x32xf32, #tpu.memory_space<vmem>>, vector<1x32xf32>
      %37 = vector.broadcast %36 : vector<1x32xf32> to vector<16x32xf32>
      %38 = arith.addf %35, %37 : vector<16x32xf32>
      %39 = arith.truncf %38 : vector<16x32xf32> to vector<16x32xbf16>
      %c0_30 = arith.constant 0 : index
      %c0_31 = arith.constant 0 : index
      %c0_32 = arith.constant 0 : index
      %40 = vector.load %arg9[%c0_30, %c0_31, %c0_32] : memref<1x16x32xbf16, #tpu.memory_space<vmem>>, vector<1x16x32xbf16>
      %41 = vector.shape_cast %40 : vector<1x16x32xbf16> to vector<16x32xbf16>
      %42 = vector.shape_cast %39 : vector<16x32xbf16> to vector<1x16x32xbf16>
      tpu.vector_store %arg9[%c0_30, %c0_31, %c0_32], %42 {strides = array<i32>} : memref<1x16x32xbf16, #tpu.memory_space<vmem>>, vector<1x16x32xbf16>,
    } else {
    }
    return
  }
  func.func @transform_0(%arg0: i32, %arg1: i32, %arg2: i32) -> (i32, i32, i32, i32) {
    %c0_i32 = arith.constant 0 : i32
    %c0_i32_0 = arith.constant 0 : i32
    return %arg0, %arg2, %arg1, %c0_i32 : i32, i32, i32, i32
  }
  func.func @transform_1(%arg0: i32, %arg1: i32, %arg2: i32) -> (i32, i32, i32, i32) {
    %c0_i32 = arith.constant 0 : i32
    %c0_i32_0 = arith.constant 0 : i32
    %c0_i32_1 = arith.constant 0 : i32
    return %arg0, %arg2, %c0_i32, %c0_i32_0 : i32, i32, i32, i32
  }
  func.func @transform_2(%arg0: i32, %arg1: i32, %arg2: i32) -> (i32, i32, i32, i32) {
    %c0_i32 = arith.constant 0 : i32
    %c0_i32_0 = arith.constant 0 : i32
    %c0_i32_1 = arith.constant 0 : i32
    return %arg0, %arg2, %c0_i32, %c0_i32_0 : i32, i32, i32, i32
  }
  func.func @transform_3(%arg0: i32, %arg1: i32, %arg2: i32) -> (i32, i32) {
    %c0_i32 = arith.constant 0 : i32
    %c0_i32_0 = arith.constant 0 : i32
    return %arg2, %c0_i32 : i32, i32
  }
  func.func @transform_4(%arg0: i32, %arg1: i32, %arg2: i32) -> (i32, i32) {
    %c0_i32 = arith.constant 0 : i32
    %c0_i32_0 = arith.constant 0 : i32
    %c0_i32_1 = arith.constant 0 : i32
    return %c0_i32, %c0_i32_0 : i32, i32
  }
  func.func @transform_5(%arg0: i32, %arg1: i32, %arg2: i32) -> (i32, i32, i32) {
    %c0_i32 = arith.constant 0 : i32
    %c0_i32_0 = arith.constant 0 : i32
    return %arg0, %arg1, %c0_i32 : i32, i32, i32
  }
  func.func @transform_6(%arg0: i32, %arg1: i32, %arg2: i32) -> (i32, i32, i32) {
    %c0_i32 = arith.constant 0 : i32
    %c0_i32_0 = arith.constant 0 : i32
    return %arg0, %arg1, %c0_i32 : i32, i32, i32
  }
}

module attributes {stable_mosaic.version = 11 : i64} {
  func.func @mlp_block_kernel(%arg0: i32, %arg1: i32, %arg2: i32, %arg3: memref<1x16x32xbf16, #tpu.memory_space<vmem>>, %arg4: memref<1x32xf32, #tpu.memory_space<vmem>>, %arg5: memref<1x32xf32, #tpu.memory_space<vmem>>, %arg6: memref<32x128xbf16, #tpu.memory_space<vmem>>, %arg7: memref<1x128xf32, #tpu.memory_space<vmem>>, %arg8: memref<128x32xbf16, #tpu.memory_space<vmem>>, %arg9: memref<1x32xf32, #tpu.memory_space<vmem>>, %arg10: memref<1x16x32xbf16, #tpu.memory_space<vmem>>, %arg11: memref<16x32xbf16, #tpu.memory_space<vmem>>, %arg12: memref<16x32xf32, #tpu.memory_space<vmem>>) attributes {dimension_semantics = [#tpu.dimension_semantics<parallel>, #tpu.dimension_semantics<parallel>, #tpu.dimension_semantics<arbitrary>], iteration_bounds = array<i64: 2, 1, 1>, scalar_prefetch = 0 : i64, scratch_operands = 2 : i64, tpu.core_type = #tpu.core_type<tc>, window_params = [{transform_indices = @transform_0, window_bounds = array<i64: 1, 16, 32>}, {pipeline_mode = #tpu.pipeline_mode<synchronous>, transform_indices = @transform_1, window_bounds = array<i64: 1, 32>}, {pipeline_mode = #tpu.pipeline_mode<synchronous>, transform_indices = @transform_2, window_bounds = array<i64: 1, 32>}, {transform_indices = @transform_3, window_bounds = array<i64: 32, 128>}, {transform_indices = @transform_4, window_bounds = array<i64: 1, 128>}, {transform_indices = @transform_5, window_bounds = array<i64: 128, 32>}, {pipeline_mode = #tpu.pipeline_mode<synchronous>, transform_indices = @transform_6, window_bounds = array<i64: 1, 32>}, {transform_indices = @transform_7, window_bounds = array<i64: 1, 16, 32>}]} {
    %c0_i32 = arith.constant 0 : i32
    %0 = arith.cmpi eq, %arg2, %c0_i32 : i32
    %1 = arith.extui %0 : i1 to i32
    %c0_i32_0 = arith.constant 0 : i32
    %2 = arith.cmpi ne, %1, %c0_i32_0 : i32
    scf.if %2 {
      %c0_19 = arith.constant 0 : index
      %c0_20 = arith.constant 0 : index
      %c0_21 = arith.constant 0 : index
      %31 = vector.load %arg3[%c0_19, %c0_20, %c0_21] : memref<1x16x32xbf16, #tpu.memory_space<vmem>>, vector<1x16x32xbf16>
      %32 = vector.shape_cast %31 : vector<1x16x32xbf16> to vector<16x32xbf16>
      %33 = arith.extf %32 : vector<16x32xbf16> to vector<16x32xf32>
      %c0_22 = arith.constant 0 : index
      %c0_23 = arith.constant 0 : index
      %34 = vector.load %arg4[%c0_22, %c0_23] : memref<1x32xf32, #tpu.memory_space<vmem>>, vector<1x32xf32>
      %c0_24 = arith.constant 0 : index
      %c0_25 = arith.constant 0 : index
      %35 = vector.load %arg5[%c0_24, %c0_25] : memref<1x32xf32, #tpu.memory_space<vmem>>, vector<1x32xf32>
      %cst_26 = arith.constant dense<0.000000e+00> : vector<16xf32>
      %36 = vector.multi_reduction <add>, %33, %cst_26 [1] : vector<16x32xf32> to vector<16xf32>
      %37 = vector.shape_cast %36 : vector<16xf32> to vector<16x1xf32>
      %cst_27 = arith.constant 3.200000e+01 : f32
      %38 = vector.broadcast %cst_27 : f32 to vector<16x1xf32>
      %39 = arith.divf %37, %38 : vector<16x1xf32>
      %40 = vector.broadcast %39 : vector<16x1xf32> to vector<16x32xf32>
      %41 = arith.subf %33, %40 : vector<16x32xf32>
      %42 = arith.mulf %41, %41 : vector<16x32xf32>
      %cst_28 = arith.constant dense<0.000000e+00> : vector<16xf32>
      %43 = vector.multi_reduction <add>, %42, %cst_28 [1] : vector<16x32xf32> to vector<16xf32>
      %44 = vector.shape_cast %43 : vector<16xf32> to vector<16x1xf32>
      %cst_29 = arith.constant 3.200000e+01 : f32
      %45 = vector.broadcast %cst_29 : f32 to vector<16x1xf32>
      %46 = arith.divf %44, %45 : vector<16x1xf32>
      %47 = vector.broadcast %39 : vector<16x1xf32> to vector<16x32xf32>
      %48 = arith.subf %33, %47 : vector<16x32xf32>
      %cst_30 = arith.constant 9.99999974E-6 : f32
      %49 = vector.broadcast %cst_30 : f32 to vector<16x1xf32>
      %50 = arith.addf %46, %49 : vector<16x1xf32>
      %51 = math.rsqrt %50 : vector<16x1xf32>
      %52 = vector.broadcast %51 : vector<16x1xf32> to vector<16x32xf32>
      %53 = arith.mulf %48, %52 : vector<16x32xf32>
      %54 = vector.broadcast %34 : vector<1x32xf32> to vector<16x32xf32>
      %55 = arith.mulf %53, %54 : vector<16x32xf32>
      %56 = vector.broadcast %35 : vector<1x32xf32> to vector<16x32xf32>
      %57 = arith.addf %55, %56 : vector<16x32xf32>
      %58 = arith.truncf %57 : vector<16x32xf32> to vector<16x32xbf16>
      %c0_31 = arith.constant 0 : index
      %c0_32 = arith.constant 0 : index
      %59 = vector.load %arg11[%c0_31, %c0_32] : memref<16x32xbf16, #tpu.memory_space<vmem>>, vector<16x32xbf16>
      tpu.vector_store %arg11[%c0_31, %c0_32], %58 {strides = array<i32>} : memref<16x32xbf16, #tpu.memory_space<vmem>>, vector<16x32xbf16>,
      %cst_33 = arith.constant 0.000000e+00 : f32
      %60 = vector.broadcast %cst_33 : f32 to vector<16x32xf32>
      %c0_34 = arith.constant 0 : index
      %c0_35 = arith.constant 0 : index
      %61 = vector.load %arg12[%c0_34, %c0_35] : memref<16x32xf32, #tpu.memory_space<vmem>>, vector<16x32xf32>
      tpu.vector_store %arg12[%c0_34, %c0_35], %60 {strides = array<i32>} : memref<16x32xf32, #tpu.memory_space<vmem>>, vector<16x32xf32>,
    } else {
    }
    %c0 = arith.constant 0 : index
    %c0_1 = arith.constant 0 : index
    %3 = vector.load %arg11[%c0, %c0_1] : memref<16x32xbf16, #tpu.memory_space<vmem>>, vector<16x32xbf16>
    %c0_2 = arith.constant 0 : index
    %c0_3 = arith.constant 0 : index
    %4 = vector.load %arg6[%c0_2, %c0_3] : memref<32x128xbf16, #tpu.memory_space<vmem>>, vector<32x128xbf16>
    %cst = arith.constant dense<0.000000e+00> : vector<16x128xf32>
    %5 = tpu.matmul %3, %4, %cst {dimension_numbers = #tpu.dot_dimension_numbers<[1], [0], [0], [1], [0, 0, 1, 1], [], []>} : vector<16x32xbf16>, vector<32x128xbf16>, vector<16x128xf32> -> vector<16x128xf32>
    %c0_4 = arith.constant 0 : index
    %c0_5 = arith.constant 0 : index
    %6 = vector.load %arg7[%c0_4, %c0_5] : memref<1x128xf32, #tpu.memory_space<vmem>>, vector<1x128xf32>
    %7 = vector.broadcast %6 : vector<1x128xf32> to vector<16x128xf32>
    %8 = arith.addf %5, %7 : vector<16x128xf32>
    %cst_6 = arith.constant 5.000000e-01 : f32
    %9 = vector.broadcast %cst_6 : f32 to vector<16x128xf32>
    %10 = arith.mulf %9, %8 : vector<16x128xf32>
    %cst_7 = arith.constant 4.471500e-02 : f32
    %11 = vector.broadcast %cst_7 : f32 to vector<16x128xf32>
    %12 = arith.mulf %11, %8 : vector<16x128xf32>
    %13 = arith.mulf %12, %8 : vector<16x128xf32>
    %14 = arith.mulf %13, %8 : vector<16x128xf32>
    %15 = arith.addf %8, %14 : vector<16x128xf32>
    %cst_8 = arith.constant 0.797884583 : f32
    %16 = vector.broadcast %cst_8 : f32 to vector<16x128xf32>
    %17 = arith.mulf %16, %15 : vector<16x128xf32>
    %18 = math.tanh %17 : vector<16x128xf32>
    %cst_9 = arith.constant 1.000000e+00 : f32
    %19 = vector.broadcast %cst_9 : f32 to vector<16x128xf32>
    %20 = arith.addf %19, %18 : vector<16x128xf32>
    %21 = arith.mulf %10, %20 : vector<16x128xf32>
    %c0_10 = arith.constant 0 : index
    %c0_11 = arith.constant 0 : index
    %22 = vector.load %arg12[%c0_10, %c0_11] : memref<16x32xf32, #tpu.memory_space<vmem>>, vector<16x32xf32>
    %23 = arith.truncf %21 : vector<16x128xf32> to vector<16x128xbf16>
    %c0_12 = arith.constant 0 : index
    %c0_13 = arith.constant 0 : index
    %24 = vector.load %arg8[%c0_12, %c0_13] : memref<128x32xbf16, #tpu.memory_space<vmem>>, vector<128x32xbf16>
    %cst_14 = arith.constant dense<0.000000e+00> : vector<16x32xf32>
    %25 = tpu.matmul %23, %24, %cst_14 {dimension_numbers = #tpu.dot_dimension_numbers<[1], [0], [0], [1], [0, 0, 1, 1], [], []>} : vector<16x128xbf16>, vector<128x32xbf16>, vector<16x32xf32> -> vector<16x32xf32>
    %26 = arith.addf %22, %25 : vector<16x32xf32>
    %c0_15 = arith.constant 0 : index
    %c0_16 = arith.constant 0 : index
    %27 = vector.load %arg12[%c0_15, %c0_16] : memref<16x32xf32, #tpu.memory_space<vmem>>, vector<16x32xf32>
    tpu.vector_store %arg12[%c0_15, %c0_16], %26 {strides = array<i32>} : memref<16x32xf32, #tpu.memory_space<vmem>>, vector<16x32xf32>,
    %c0_i32_17 = arith.constant 0 : i32
    %28 = arith.cmpi eq, %arg2, %c0_i32_17 : i32
    %29 = arith.extui %28 : i1 to i32
    %c0_i32_18 = arith.constant 0 : i32
    %30 = arith.cmpi ne, %29, %c0_i32_18 : i32
    scf.if %30 {
      %c0_19 = arith.constant 0 : index
      %c0_20 = arith.constant 0 : index
      %c0_21 = arith.constant 0 : index
      %31 = vector.load %arg3[%c0_19, %c0_20, %c0_21] : memref<1x16x32xbf16, #tpu.memory_space<vmem>>, vector<1x16x32xbf16>
      %32 = vector.shape_cast %31 : vector<1x16x32xbf16> to vector<16x32xbf16>
      %33 = arith.extf %32 : vector<16x32xbf16> to vector<16x32xf32>
      %c0_22 = arith.constant 0 : index
      %c0_23 = arith.constant 0 : index
      %34 = vector.load %arg12[%c0_22, %c0_23] : memref<16x32xf32, #tpu.memory_space<vmem>>, vector<16x32xf32>
      %35 = arith.addf %33, %34 : vector<16x32xf32>
      %c0_24 = arith.constant 0 : index
      %c0_25 = arith.constant 0 : index
      %36 = vector.load %arg9[%c0_24, %c0_25] : memref<1x32xf32, #tpu.memory_space<vmem>>, vector<1x32xf32>
      %37 = vector.broadcast %36 : vector<1x32xf32> to vector<16x32xf32>
      %38 = arith.addf %35, %37 : vector<16x32xf32>
      %39 = arith.truncf %38 : vector<16x32xf32> to vector<16x32xbf16>
      %c0_26 = arith.constant 0 : index
      %c0_27 = arith.constant 0 : index
      %c0_28 = arith.constant 0 : index
      %40 = vector.load %arg10[%c0_26, %c0_27, %c0_28] : memref<1x16x32xbf16, #tpu.memory_space<vmem>>, vector<1x16x32xbf16>
      %41 = vector.shape_cast %40 : vector<1x16x32xbf16> to vector<16x32xbf16>
      %42 = vector.shape_cast %39 : vector<16x32xbf16> to vector<1x16x32xbf16>
      tpu.vector_store %arg10[%c0_26, %c0_27, %c0_28], %42 {strides = array<i32>} : memref<1x16x32xbf16, #tpu.memory_space<vmem>>, vector<1x16x32xbf16>,
    } else {
    }
    return
  }
  func.func @transform_0(%arg0: i32, %arg1: i32, %arg2: i32) -> (i32, i32, i32) {
    %c0_i32 = arith.constant 0 : i32
    %c0_i32_0 = arith.constant 0 : i32
    return %arg0, %arg1, %c0_i32 : i32, i32, i32
  }
  func.func @transform_1(%arg0: i32, %arg1: i32, %arg2: i32) -> (i32, i32) {
    %c0_i32 = arith.constant 0 : i32
    %c0_i32_0 = arith.constant 0 : i32
    %c0_i32_1 = arith.constant 0 : i32
    return %c0_i32, %c0_i32_0 : i32, i32
  }
  func.func @transform_2(%arg0: i32, %arg1: i32, %arg2: i32) -> (i32, i32) {
    %c0_i32 = arith.constant 0 : i32
    %c0_i32_0 = arith.constant 0 : i32
    %c0_i32_1 = arith.constant 0 : i32
    return %c0_i32, %c0_i32_0 : i32, i32
  }
  func.func @transform_3(%arg0: i32, %arg1: i32, %arg2: i32) -> (i32, i32) {
    %c0_i32 = arith.constant 0 : i32
    %c0_i32_0 = arith.constant 0 : i32
    return %c0_i32, %arg2 : i32, i32
  }
  func.func @transform_4(%arg0: i32, %arg1: i32, %arg2: i32) -> (i32, i32) {
    %c0_i32 = arith.constant 0 : i32
    %c0_i32_0 = arith.constant 0 : i32
    return %c0_i32, %arg2 : i32, i32
  }
  func.func @transform_5(%arg0: i32, %arg1: i32, %arg2: i32) -> (i32, i32) {
    %c0_i32 = arith.constant 0 : i32
    %c0_i32_0 = arith.constant 0 : i32
    return %arg2, %c0_i32 : i32, i32
  }
  func.func @transform_6(%arg0: i32, %arg1: i32, %arg2: i32) -> (i32, i32) {
    %c0_i32 = arith.constant 0 : i32
    %c0_i32_0 = arith.constant 0 : i32
    %c0_i32_1 = arith.constant 0 : i32
    return %c0_i32, %c0_i32_0 : i32, i32
  }
  func.func @transform_7(%arg0: i32, %arg1: i32, %arg2: i32) -> (i32, i32, i32) {
    %c0_i32 = arith.constant 0 : i32
    %c0_i32_0 = arith.constant 0 : i32
    return %arg0, %arg1, %c0_i32 : i32, i32, i32
  }
}

module attributes {stable_mosaic.version = 11 : i64} {
  func.func @head_kernel(%arg0: memref<2x32xbf16, #tpu.memory_space<vmem>>, %arg1: memref<1x32xf32, #tpu.memory_space<vmem>>, %arg2: memref<1x32xf32, #tpu.memory_space<vmem>>, %arg3: memref<32x128xbf16, #tpu.memory_space<vmem>>, %arg4: memref<1x128xf32, #tpu.memory_space<vmem>>, %arg5: memref<2x128xf32, #tpu.memory_space<vmem>>) attributes {dimension_semantics = [], scalar_prefetch = 0 : i64, scratch_operands = 0 : i64, tpu.core_type = #tpu.core_type<tc>} {
    %c0 = arith.constant 0 : index
    %c0_0 = arith.constant 0 : index
    %0 = vector.load %arg0[%c0, %c0_0] : memref<2x32xbf16, #tpu.memory_space<vmem>>, vector<2x32xbf16>
    %1 = arith.extf %0 : vector<2x32xbf16> to vector<2x32xf32>
    %c0_1 = arith.constant 0 : index
    %c0_2 = arith.constant 0 : index
    %2 = vector.load %arg1[%c0_1, %c0_2] : memref<1x32xf32, #tpu.memory_space<vmem>>, vector<1x32xf32>
    %c0_3 = arith.constant 0 : index
    %c0_4 = arith.constant 0 : index
    %3 = vector.load %arg2[%c0_3, %c0_4] : memref<1x32xf32, #tpu.memory_space<vmem>>, vector<1x32xf32>
    %cst = arith.constant dense<0.000000e+00> : vector<2xf32>
    %4 = vector.multi_reduction <add>, %1, %cst [1] : vector<2x32xf32> to vector<2xf32>
    %5 = vector.shape_cast %4 : vector<2xf32> to vector<2x1xf32>
    %cst_5 = arith.constant 3.200000e+01 : f32
    %6 = vector.broadcast %cst_5 : f32 to vector<2x1xf32>
    %7 = arith.divf %5, %6 : vector<2x1xf32>
    %8 = vector.broadcast %7 : vector<2x1xf32> to vector<2x32xf32>
    %9 = arith.subf %1, %8 : vector<2x32xf32>
    %10 = arith.mulf %9, %9 : vector<2x32xf32>
    %cst_6 = arith.constant dense<0.000000e+00> : vector<2xf32>
    %11 = vector.multi_reduction <add>, %10, %cst_6 [1] : vector<2x32xf32> to vector<2xf32>
    %12 = vector.shape_cast %11 : vector<2xf32> to vector<2x1xf32>
    %cst_7 = arith.constant 3.200000e+01 : f32
    %13 = vector.broadcast %cst_7 : f32 to vector<2x1xf32>
    %14 = arith.divf %12, %13 : vector<2x1xf32>
    %15 = vector.broadcast %7 : vector<2x1xf32> to vector<2x32xf32>
    %16 = arith.subf %1, %15 : vector<2x32xf32>
    %cst_8 = arith.constant 9.99999974E-6 : f32
    %17 = vector.broadcast %cst_8 : f32 to vector<2x1xf32>
    %18 = arith.addf %14, %17 : vector<2x1xf32>
    %19 = math.rsqrt %18 : vector<2x1xf32>
    %20 = vector.broadcast %19 : vector<2x1xf32> to vector<2x32xf32>
    %21 = arith.mulf %16, %20 : vector<2x32xf32>
    %22 = vector.broadcast %2 : vector<1x32xf32> to vector<2x32xf32>
    %23 = arith.mulf %21, %22 : vector<2x32xf32>
    %24 = vector.broadcast %3 : vector<1x32xf32> to vector<2x32xf32>
    %25 = arith.addf %23, %24 : vector<2x32xf32>
    %26 = arith.truncf %25 : vector<2x32xf32> to vector<2x32xbf16>
    %c0_9 = arith.constant 0 : index
    %c0_10 = arith.constant 0 : index
    %27 = vector.load %arg3[%c0_9, %c0_10] : memref<32x128xbf16, #tpu.memory_space<vmem>>, vector<32x128xbf16>
    %cst_11 = arith.constant dense<0.000000e+00> : vector<2x128xf32>
    %28 = tpu.matmul %26, %27, %cst_11 {dimension_numbers = #tpu.dot_dimension_numbers<[1], [0], [0], [1], [0, 0, 1, 1], [], []>} : vector<2x32xbf16>, vector<32x128xbf16>, vector<2x128xf32> -> vector<2x128xf32>
    %c0_12 = arith.constant 0 : index
    %c0_13 = arith.constant 0 : index
    %29 = vector.load %arg4[%c0_12, %c0_13] : memref<1x128xf32, #tpu.memory_space<vmem>>, vector<1x128xf32>
    %30 = vector.broadcast %29 : vector<1x128xf32> to vector<2x128xf32>
    %31 = arith.addf %28, %30 : vector<2x128xf32>
    %c0_14 = arith.constant 0 : index
    %c0_15 = arith.constant 0 : index
    %32 = vector.load %arg5[%c0_14, %c0_15] : memref<2x128xf32, #tpu.memory_space<vmem>>, vector<2x128xf32>
    tpu.vector_store %arg5[%c0_14, %c0_15], %31 {strides = array<i32>} : memref<2x128xf32, #tpu.memory_space<vmem>>, vector<2x128xf32>,
    return
  }
}

</mosaic_0001>

<bundles_post_ra>
// kernel: tpu_custom_call.1
= control target key start
LH: loop header
LB: loop body
LE: loop exit
PB: predicated region body
PF: predicated region fallthrough
CT: control target
= control target key end

     0   :  { %7 = vsyncpa [#allocation3], 0  ;;  %s649_s0 = inlined_call_operand.hbm [shape: f32[16,128], index: 0, kind: input, shape index: {}]   ;;  %s650_s1 = inlined_call_operand.hbm [shape: f32[8,128], index: 1, kind: input, shape index: {}]   ;;  %s651_s2 = inlined_call_operand.hbm [shape: f32[16,128], index: 2, kind: output, shape index: {}]  }
   0x1   :  { %9 = vsyncpa [#allocation3 + $0x1], 0 }
   0x2   :  { %10 = vsyncpa [#allocation6], 0 }
   0x3   :  { %11 = vsyncpa [#allocation4], 0 }
   0x4   :  { %13 = vsyncpa [#allocation4 + $0x1], 0  ;;  %s483_s9 = smov 0   ;;  %s485_s10 = smov 0  }
   0x5   :  { %s487_s11 = smov 0   ;;  %s489_s12 = smov 0  }
   0x6 LB: > { %s504_s13 = sadd.s32 4294967295, %s463_s12   ;;  %s270_s14 = sadd.s32 4294967294, %s463_s12   ;;  %s463_s12 = sphi %s489_s12, %s674_s12   ;;  %s459_s11 = sphi %s487_s11, %s673_s11   ;;  %s455_s10 = sphi %s485_s10, %s672_s10   ;;  %s451_s9 = sphi %s483_s9, %s671_s9  }
   0x7   : > { %p39_p0 = scmp.ne.s32.totalorder %s455_s10, %s451_s9  ;;  %p652_p1 = scmp.eq.s32.totalorder %s504_s13, 0 }
   0x8   : > { %p90_p3 = scmp.eq.s32.totalorder %s270_s14, 1  ;;  %p271_p5 = scmp.ge.s32.totalorder %s463_s12, 1 }
   0x9   : > { %p513_p4 = por %p652_p1, %p39_p0  ;;  %p97_p7 = scmp.lt.s32.totalorder %s463_s12, 3 }
   0xa   : > { %p518_p6 = por %p90_p3, %p39_p0  ;;  %s465_s18 = smov [#allocation5]  }
   0xb   : > { %s656_s15 = scalar_select %p513_p4, 1, 0 }
   0xc   : > { %s657_s16 = scalar_select %p518_p6, 1, 0 }
   0xd   : > { %p523_p8 = pnand %p271_p5, %p97_p7  ;;  %s110_s19 = sshll.u32 %s465_s18, 4  ;;  %s111_s19 = int_to_ptr.vmem [resolvable:$true] %s110_s19 }
   0xe   : > { %s531_s20 = sadd.s32 1, %s463_s12   ;;  %s26_s24 = sadd.s32 1, %s459_s11 }
   0xf   : > { %s658_s17 = scalar_select %p523_p8, 1, 0 }
  0x10   : > { %p292_p10 = pneg %p523_p8  ;;  %s23_s22 = ssub.s32 %s463_s12, %s531_s20 }
  0x11   : > { %p541_p12 = scmp.eq.s32.totalorder %s23_s22, 0  ;;  %p33_p13 = scmp.ne.s32.totalorder %s459_s11, %s455_s10 }
  0x12   : > { %p535_p11 = pnand %p292_p10, %p652_p1  ;;  %s352_s25 = scalar_lea.vmem %s111_s19, 128 }
  0x13   : > { %p353_p3 = scmp.ne.s32.totalorder %s111_s19, %s352_s25  ;;  %p360_p9 = scmp.lt.s32.totalorder %s111_s19, %s111_s19 }
  0x14   : > { %p343_p0 = pneg %p535_p11  ;;  %p361_p2 = scmp.lt.s32.totalorder %s352_s25, %s352_s25 }
  0x16   : > { %p355_p5 = pnand %p353_p3, %p343_p0  ;;  %p362_p10 = por %p361_p2, %p360_p9 }
  0x18   : > { %p356_p7 = pneg %p355_p5 }
  0x1a   : > { %p363_p1 = pnand %p362_p10, %p356_p7 }
  0x1c   : > { %366 = shalt.err (!%p363_p1)
}
  0x1d   : > { %295 = dma.hbm_to_vmem [thread:$0]  (!%p535_p11), %s650_s1, 128, %s111_s19, [#allocation6]  }
  0x1e   : > { %s558_s28 = scalar_select %p541_p12, %s459_s11, %s26_s24  }
  0x1f   : > { %p34_p1 = scmp.eq.s32.totalorder %s463_s12, 0  ;;  %p661_p2 = scmp.eq.s32.totalorder %s504_s13, 1 }
  0x20   : > { %p305_p0 = scmp.lt.s32.totalorder %s463_s12, 2  ;;  %s121_s30 = sand.u32 1, %s459_s11  }
  0x21   : > { %p566_p9 = por %p661_p2, %p33_p13  ;;  %p35_p3 = por %p34_p1, %p33_p13 }
  0x22   : > { %s274_s3 = sshll.u32 %s121_s30, 3  ;;  %s275_s4 = sshll.u32 %s463_s12, 7 }
  0x23   : > { %s662_s29 = scalar_select %p566_p9, 1, 0 }
  0x24   : > { %s579_s7 = scalar_lea.hbm %s649_s0, %s275_s4  ;;  %s125_s8 = scalar_lea.vmem [#allocation2], %s274_s3 }
  0x25   : > { %s132_s14 = sshll.u32 %s125_s8, 4  ;;  %p581_p11 = pnand %p305_p0, %p35_p3  ;;  %s133_s14 = int_to_ptr.vmem [resolvable:$true] %s132_s14 }
  0x26   : > { %s122_s19 = scalar_lea.sflag [#allocation3], %s121_s30  ;;  %s367_s21 = scalar_lea.hbm %s579_s7, 128 }
  0x27   : > { %p368_p12 = scmp.ne.s32.totalorder %s579_s7, %s367_s21  ;;  %p369_p13 = pneg %p581_p11 }
  0x28   : > { %s372_s24 = scalar_lea.hbm %s649_s0, 256  ;;  %p373_p10 = scmp.lt.s32.totalorder %s579_s7, %s649_s0 }
  0x29   : > { %p370_p5 = pnand %p369_p13, %p368_p12  ;;  %p374_p1 = scmp.lt.s32.totalorder %s372_s24, %s367_s21 }
  0x2b   : > { %p371_p7 = pneg %p370_p5  ;;  %p375_p2 = por %p374_p1, %p373_p10 }
  0x2d   : > { %p376_p0 = pnand %p375_p2, %p371_p7 }
  0x2f   : > { %379 = shalt.err (!%p376_p0)
}
  0x30   : > { %s380_s27 = scalar_lea.vmem %s133_s14, 128  ;;  %s466_s30 = smov [#allocation2]  }
  0x31   : > { %p381_p3 = scmp.ne.s32.totalorder %s133_s14, %s380_s27  ;;  %s385_s3 = sshll.u32 %s466_s30, 4  ;;  %s386_s3 = int_to_ptr.vmem [resolvable:$false] %s385_s3 }
  0x32   : > { %s387_s4 = scalar_lea.vmem %s386_s3, 256  ;;  %p388_p12 = scmp.lt.s32.totalorder %s133_s14, %s386_s3 }
  0x33   : > { %p383_p6 = pnand %p381_p3, %p369_p13  ;;  %p389_p5 = scmp.lt.s32.totalorder %s387_s4, %s380_s27 }
  0x35   : > { %p384_p9 = pneg %p383_p6  ;;  %p390_p4 = por %p389_p5, %p388_p12 }
  0x37   : > { %p391_p8 = pnand %p390_p4, %p384_p9 }
  0x39   : > { %394 = shalt.err (!%p391_p8)
}
  0x3a   : > { %299 = dma.hbm_to_vmem [thread:$0]  (!%p581_p11), %s579_s7, 128, %s133_s14, %s122_s19  }
  0x3b   : > { %p664_p7 = scmp.ne.s32.totalorder %s658_s17, 0 }
  0x3c   : > { %s602_s5 = sand.u32 (!%p664_p7), 1, %s455_s10   ;;  %p665_p6 = scmp.ne.s32.totalorder (!%p664_p7), %s656_s15, 0 }
  0x3d   : > { %141 = sbr.rel (%p664_p7) target bundleno = 95 (0x5f), region = 28  ;;  %s277_s6 = sshll.u32 (!%p664_p7), %s602_s5, 3 }
  0x3e   : > { %s144_s8 = scalar_lea.sflag (!%p664_p7), [#allocation3], %s602_s5  ;;  %s147_s21 = scalar_lea.vmem (!%p664_p7), [#allocation2], %s277_s6 }
  0x42   : > { %438 = dma.done.wait (%p665_p6), %s144_s8, 128  }
  0x43   : > { %440 = vsyncadd (%p665_p6), %s144_s8, 4294967168  ;;  %p666_p4 = scmp.eq.s32.totalorder %s504_s13, 0 }
  0x45   : > { %442 = dma.done.wait (%p666_p4), [#allocation6], 128   ;;  %p667_p8 = pmov %p666_p4 }
  0x46   : > { %s171_s17 = scalar_lea.vmem [#allocation7], %s277_s6  ;;  %s281_s14 = sshll.u32 %s504_s13, 7  ;;  %v172_v0 = vld [vmem:[%s147_s21] sm:$0xff]  ;;  %v173_v1 = vld [vmem:[#allocation5] sm:$0xff] }
  0x47   : > { %444 = vsyncadd (%p667_p8), [#allocation6], 4294967168  ;;  %s190_s7 = sshll.u32 %s171_s17, 4  ;;  %v174_v2 = vadd.f32 %v173_v1, %v172_v0  ;;  %s188_s15 = scalar_lea.hbm %s651_s2, %s281_s14  ;;  %s191_s7 = int_to_ptr.vmem [resolvable:$true] %s190_s7 }
  0x48   : > { %s177_s22 = scalar_lea.sflag [#allocation4], %s602_s5  ;;  %s395_s23 = scalar_lea.vmem %s191_s7, 128 }
  0x49   : > { %175 = vst [vmem:[%s171_s17] sm:$0xff] %v174_v2  ;;  %p396_p9 = scmp.ne.s32.totalorder %s191_s7, %s395_s23  ;;  %p668_p11 = scmp.ne.s32.totalorder %s662_s29, 0 }
  0x4a   : > { %s467_s24 = smov [#allocation7]  }
  0x4b   : > { %p397_p13 = pnand %p396_p9, %p668_p11  ;;  %s399_s25 = sshll.u32 %s467_s24, 4  ;;  %s400_s25 = int_to_ptr.vmem [resolvable:$false] %s399_s25 }
  0x4c   : > { %s401_s26 = scalar_lea.vmem %s400_s25, 256  ;;  %p402_p1 = scmp.lt.s32.totalorder %s191_s7, %s400_s25 }
  0x4d   : > { %p398_p10 = pneg %p397_p13  ;;  %p403_p2 = scmp.lt.s32.totalorder %s401_s26, %s395_s23 }
  0x4f   : > { %p404_p0 = por %p403_p2, %p402_p1 }
  0x51   : > { %p405_p3 = pnand %p404_p0, %p398_p10 }
  0x53   : > { %408 = shalt.err (!%p405_p3)
}
  0x54   : > { %s409_s13 = scalar_lea.hbm %s188_s15, 128  ;;  %s413_s3 = scalar_lea.hbm %s651_s2, 256 }
  0x55   : > { %p410_p12 = scmp.ne.s32.totalorder %s188_s15, %s409_s13  ;;  %p414_p6 = scmp.lt.s32.totalorder %s188_s15, %s651_s2 }
  0x56   : > { %p415_p4 = scmp.lt.s32.totalorder %s413_s3, %s409_s13 }
  0x57   : > { %p411_p5 = pnand %p410_p12, %p668_p11 }
  0x58   : > { %p416_p8 = por %p415_p4, %p414_p6 }
  0x59   : > { %p412_p7 = pneg %p411_p5 }
  0x5b   : > { %p417_p9 = pnand %p416_p8, %p412_p7 }
  0x5d   : > { %420 = shalt.err (!%p417_p9)
}
  0x5e   : > { %290 = dma.vmem_to_hbm [thread:$0]  (%p668_p11), %s191_s7, 128, %s188_s15, %s177_s22  }
  0x5f PF: > { %s202_s6 = sand.u32 1, %s451_s9   ;;  %p669_p13 = scmp.ne.s32.totalorder %s657_s16, 0 }
  0x60   : > { %p670_p10 = scmp.ge.s32.totalorder %s463_s12, 2  ;;  %s203_s8 = scalar_lea.sflag [#allocation4], %s202_s6 }
  0x62   : > { %p301_p1 = pnand %p670_p10, %p669_p13 }
  0x64   : > { %p302_p2 = pneg %p301_p1 }
  0x66   : > { %446 = dma.done.wait (%p302_p2), %s203_s8, 128  }
  0x67   : > { %448 = vsyncadd (%p302_p2), %s203_s8, 4294967168  ;;  %p16_p0 = scmp.ge.s32.totalorder %s531_s20, 4   ;;  %s671_s9 = smov %s455_s10 }
  0x68   : > { %s672_s10 = smov %s459_s11  ;;  %s673_s11 = smov %s558_s28 }
  0x69   : > { %s674_s12 = smov %s531_s20  ;;  %18 = sbr.rel (!%p16_p0) target bundleno = 6 (0x6), region = 77 }
  0x6e   :  { %208 = vsyncpa [#allocation3], 1 }
  0x6f   :  { %210 = vsyncpa [#allocation3 + $0x1], 1 }
  0x70   :  { %211 = vsyncpa [#allocation6], 1 }
  0x71   :  { %212 = vsyncpa [#allocation4], 1 }
  0x72   :  { %214 = vsyncpa [#allocation4 + $0x1], 1 }

// kernel: vit_forward.8
= control target key start
LH: loop header
LB: loop body
LE: loop exit
PB: predicated region body
PF: predicated region fallthrough
CT: control target
= control target key end

     0   :  { %vm68_vm0 = vcmask 523264   ;;  %vm140_vm1 = vcmask 257024   ;;  %s243_s1 = inlined_call_operand.vmem [shape: bf16[64,32], index: 1, kind: input, shape index: {}]   ;;  %s244_s0 = inlined_call_operand.vmem [shape: bf16[32,64], index: 0, kind: input, shape index: {}]   ;;  %s245_s2 = inlined_call_operand.vmem [shape: f32[1,32], index: 2, kind: input, shape index: {}]   ;;  %s246_s3 = inlined_call_operand.vmem [shape: bf16[32,32], index: 3, kind: output, shape index: {}]  }
   0x1   :  { %v184_v0 = vld [vmem:[%s243_s1 + $0x18] sm:$0xff]   ;;  %v185_v1 = vld [vmem:[%s243_s1 + $0x10] sm:$0xff]   ;;  %v186_v2 = vld [vmem:[%s243_s1 + $0x8] sm:$0xff]  }
   0x2   :  { %172 = vmatprep.subr.bf16.mxu0 %v184_v0  ;;  %v188_v3 = vld [vmem:[%s244_s0] sm:$0xff]   ;;  %v189_v5 = vld [vmem:[%s244_s0 + $0x8] sm:$0xff]  }
   0x3   :  { %173 = vmatpush3.bf16.msra.mxu0 %v184_v0  ;;  %180 = vmatprep.mubr.msk.bf16.mxu0 %vm68_vm0, %v188_v3  ;;  %v187_v4 = vld [vmem:[%s243_s1] sm:$0xff]  }
   0x4   :  { %174 = vmatprep.subr.bf16.mxu0 %v185_v1  ;;  %v149_v6 = vld [vmem:[%s245_s2] ss:$0 sm:$0xff] }
   0x7   :  { %175 = vmatpush3.bf16.msra.mxu0 %v185_v1 }
   0x8   :  { %176 = vmatprep.subr.bf16.mxu0 %v186_v2 }
   0xb   :  { %177 = vmatpush3.bf16.msra.mxu0 %v186_v2 }
   0xc   :  { %178 = vmatprep.subr.bf16.mxu0 %v187_v4 }
   0xf   :  { %179 = vmatpush3.bf16.msra.mxu0 %v187_v4 }
  0x12   :  { %181 = vmatmul.mubr.msk.bf16.vlgmr.msra.gmra.mxu0 %vm68_vm0, %v189_v5 }
  0xd2   :  { %v182_v7 = vpop.f32.mrf.mxu0 }
  0xd3   :  { %v118_v8 = vadd.f32 %v182_v7, %v149_v6 }
  0xd4   :  { %v109_v9 = vpop.f32.mrf.mxu0 }
  0xd5   :  { %v164_v10 = vpack.c.bf16 %v118_v8, %v118_v8  ;;  %v110_v11 = vadd.f32 %v149_v6, %v109_v9 }
  0xd6   :  { %v183_v12 = vpop.f32.mrf.mxu0 }
  0xd7   :  { %143 = vst.msk [vmem:[%s246_s3 + $0x8] sm:$0xf] %vm140_vm1, %v164_v10  ;;  %v162_v13 = vpack.c.bf16 %v110_v11, %v110_v11  ;;  %v121_v14 = vadd.f32 %v183_v12, %v149_v6 }
  0xd8   :  { %v112_v15 = vpop.f32.mrf.mxu0 }
  0xd9   :  { %141 = vst.msk [vmem:[%s246_s3] sm:$0xf] %vm140_vm1, %v162_v13  ;;  %v165_v16 = vpack.c.bf16 %v121_v14, %v121_v14  ;;  %v113_v17 = vadd.f32 %v149_v6, %v112_v15 }
  0xdb   :  { %144 = vst.msk [vmem:[%s246_s3 + $0xc] sm:$0xf] %vm140_vm1, %v165_v16  ;;  %v163_v18 = vpack.c.bf16 %v113_v17, %v113_v17 }
  0xdd   :  { %142 = vst.msk [vmem:[%s246_s3 + $0x4] sm:$0xf] %vm140_vm1, %v163_v18 }

// kernel: vit_forward.9
= control target key start
LH: loop header
LB: loop body
LE: loop exit
PB: predicated region body
PF: predicated region fallthrough
CT: control target
= control target key end

     0   :  { %s567_s15 = smov 0   ;;  %s569_s16 = smov 0   ;;  %s624_s0 = inlined_call_operand.vmem [shape: bf16[2,16,32], index: 0, kind: input, shape index: {}]   ;;  %s625_s1 = inlined_call_operand.vmem [shape: f32[1,32], index: 1, kind: input, shape index: {}]   ;;  %s626_s2 = inlined_call_operand.vmem [shape: f32[1,32], index: 2, kind: input, shape index: {}]   ;;  %s627_s3 = inlined_call_operand.vmem [shape: bf16[32,96], index: 3, kind: input, shape index: {}]   ;;  %s628_s4 = inlined_call_operand.vmem [shape: bf16[2,16,96], index: 4, kind: output, shape index: {}]  }
   0x1   :  { %s571_s17 = smov 0  }
   0x2 LB: > { %s26_s18 = sadd.s32 1, %s534_s16  ;;  %p451_p0 = scmp.ge.s32.totalorder %s538_s17, 1  ;;  %s538_s17 = sphi %s571_s17, %s14_s17   ;;  %s534_s16 = sphi %s569_s16, %s630_s16   ;;  %s530_s15 = sphi %s567_s15, %s629_s15  }
   0x3   : > { %p28_p1 = scmp.ge.s32.totalorder %s26_s18, 2  ;;  %p183_p2 = scmp.lt.s32.totalorder %s538_s17, 3 }
   0x5   : > { %s632_s18 = smov (%p28_p1, %s26_s18), 0  ;;  %p184_p3 = pnand %p451_p0, %p183_p2 }
   0x6   : > { %p218_p4 = scmp.lt.s32.totalorder (!%p184_p3), %s530_s15, 1 }
   0x7   : > { %187 = sbr.rel (%p184_p3) target bundleno = 532 (0x214), region = 36 }
   0xc   : > { %s634_s15 = smov (!%p218_p4, %s530_s15), 1  ;;  %vm244_vm0 = vcmask 261120   ;;  %v510_v15 = vld [vmem:[%s627_s3 + $0x8] sm:$0xff]   ;;  %v540_v16 = vmov 0.0   ;;  %vm541_vm1 = vmmov 0   ;;  %v511_v17 = vld [vmem:[%s627_s3] sm:$0xff]  }
   0xd   : > { %s465_s19 = sshll.u32 %s634_s15, 3  ;;  %476 = vmatprep.subr.bf16.mxu0 %v540_v16  ;;  %480 = vmatprep.mubr.msk.bf16.mxu0 %vm541_vm1, %v540_v16  ;;  %v456_v26 = vld [vmem:[%s625_s1] ss:$0 sm:$0xff]  ;;  %vm357_vm2 = vcmask 781312  }
   0xe   : > { %s225_s22 = scalar_lea.vmem %s624_s0, %s465_s19  ;;  %477 = vmatpush3.bf16.msra.mxu0 %v510_v15  ;;  %v457_v30 = vld [vmem:[%s626_s2] ss:$0 sm:$0xff]  ;;  %s235_s7 = scalar_lea.vmem %s628_s4, %s465_s19 }
   0xf   : > { %v470_v0 = vld [vmem:[%s225_s22] sm:$0xff]   ;;  %478 = vmatprep.subr.bf16.mxu0 %v540_v16 }
  0x10   : > { %v471_v1 = vunpack.c.l.bf16 %v470_v0  ;;  %v472_v2 = vunpack.c.h.bf16 %v470_v0 }
  0x12   : > { %v245_v3 = vsel %vm244_vm0, %v471_v1, 0.0  ;;  %v248_v4 = vsel %vm244_vm0, %v472_v2, 0.0  ;;  %479 = vmatpush3.bf16.msra.mxu0 %v511_v17 }
  0x13   : > { %246 = vadd.xlane.f32.xlu0 %v245_v3 }
  0x17   : > { %249 = vadd.xlane.f32.xlu0 %v248_v4 }
  0x9c   : > { %v247_v5 = vpop.xlane.xlu0 %246 }
  0x9d   : > { %v252_v6 = vmul.f32 0.03125, %v247_v5 }
  0x9f   : > { %v254_v7 = vsub.f32 %v471_v1, %v252_v6 }
  0xa0   : > { %v250_v8 = vpop.xlane.xlu0 %249 }
  0xa1   : > { %v253_v9 = vmul.f32 0.03125, %v250_v8  ;;  %v256_v10 = vmul.f32 %v254_v7, %v254_v7 }
  0xa3   : > { %v255_v11 = vsub.f32 %v472_v2, %v253_v9  ;;  %v258_v12 = vsel %vm244_vm0, %v256_v10, 0.0 }
  0xa4   : > { %259 = vadd.xlane.f32.xlu1 %v258_v12 }
  0xa5   : > { %v257_v13 = vmul.f32 %v255_v11, %v255_v11 }
  0xa7   : > { %v261_v14 = vsel %vm244_vm0, %v257_v13, 0.0 }
  0xa8   : > { %262 = vadd.xlane.f32.xlu1 %v261_v14 }
 0x12d   : > { %v260_v18 = vpop.xlane.xlu1 %259 }
 0x12e   : > { %v264_v19 = vmul.f32 0.03125, %v260_v18 }
 0x130   : > { %v266_v20 = vadd.f32 1e-05, %v264_v19 }
 0x131   : > { %v263_v21 = vpop.xlane.xlu1 %262 }
 0x132   : > { %512 = vrsqrt.f32 %v266_v20  ;;  %v265_v22 = vmul.f32 0.03125, %v263_v21 }
 0x134   : > { %v267_v23 = vadd.f32 1e-05, %v265_v22 }
 0x136   : > { %514 = vrsqrt.f32 %v267_v23 }
 0x13f   : > { %v513_v24 = vpop.eup %512 }
 0x140   : > { %v270_v25 = vmul.f32 %v513_v24, %v254_v7 }
 0x142   : > { %v278_v29 = vmul.f32 %v456_v26, %v270_v25 }
 0x143   : > { %v515_v27 = vpop.eup %514 }
 0x144   : > { %v271_v28 = vmul.f32 %v515_v27, %v255_v11  ;;  %v286_v32 = vadd.f32 %v457_v30, %v278_v29 }
 0x146   : > { %v279_v31 = vmul.f32 %v456_v26, %v271_v28 }
 0x148   : > { %v287_v33 = vadd.f32 %v457_v30, %v279_v31 }
 0x14a   : > { %v288_v34 = vpack.c.bf16 %v287_v33, %v286_v32 }
 0x14c   : > { %481 = vmatmul.mubr.msk.bf16.vlgmr.msra.gmra.mxu0 %vm244_vm0, %v288_v34 }
 0x20c   : > { %v342_v35 = vpop.f32.mrf.mxu0 }
 0x20d   : > { %v467_v36 = vpack.c.bf16 %v342_v35, %v342_v35 }
 0x20e   : > { %v482_v37 = vpop.f32.mrf.mxu0 }
 0x20f   : > { %358 = vst.msk [vmem:[%s235_s7] sm:$0xf] %vm357_vm2, %v467_v36 }
 0x210   : > { %v345_v38 = vpop.f32.mrf.mxu0 }
 0x211   : > { %v468_v39 = vpack.c.bf16 %v345_v38, %v345_v38 }
 0x212   : > { %v483_v40 = vpop.f32.mrf.mxu0 }
 0x213   : > { %359 = vst.msk [vmem:[%s235_s7 + $0x4] sm:$0xf] %vm357_vm2, %v468_v39 }
 0x214 PF: > { %s14_s17 = sadd.s32 1, %s538_s17   ;;  %s629_s15 = smov %s534_s16 }
 0x215   : > { %p11_p5 = scmp.ge.s32.totalorder %s14_s17, 4   ;;  %s630_s16 = smov %s632_s18 }
 0x217   :  { %13 = sbr.rel (!%p11_p5) target bundleno = 2 (0x2), region = 66 }

// kernel: vit_forward.10
= control target key start
LH: loop header
LB: loop body
LE: loop exit
PB: predicated region body
PF: predicated region fallthrough
CT: control target
= control target key end

     0   :  { %s1035_s21 = smov 0   ;;  %s1037_s22 = smov 0   ;;  %s1145_s0 = inlined_call_operand.vmem [shape: bf16[2,4,16,8], index: 0, kind: input, shape index: {}]   ;;  %s1146_s1 = inlined_call_operand.vmem [shape: bf16[2,4,16,8], index: 1, kind: input, shape index: {}]   ;;  %s1147_s2 = inlined_call_operand.vmem [shape: bf16[2,4,16,8], index: 2, kind: input, shape index: {}]   ;;  %s1148_s3 = inlined_call_operand.vmem [shape: bf16[32,32], index: 3, kind: input, shape index: {}]   ;;  %s1149_s4 = inlined_call_operand.vmem [shape: f32[1,32], index: 4, kind: input, shape index: {}]   ;;  %s1150_s5 = inlined_call_operand.vmem [shape: bf16[2,16,32], index: 5, kind: input, shape index: {}]   ;;  %s1151_s6 = inlined_call_operand.vmem [shape: bf16[2,16,32], index: 6, kind: output, shape index: {}]  }
   0x1   :  { %s1039_s23 = smov 0   ;;  %s1041_s24 = smov 0  }
   0x2   :  { %s1043_s25 = smov 0  }
   0x3 LB: > { %s28_s26 = sadd.s32 1, %s987_s23  ;;  %s35_s27 = sadd.s32 1, %s991_s24  ;;  %s995_s25 = sphi %s1043_s25, %s16_s25   ;;  %s991_s24 = sphi %s1041_s24, %s1155_s24   ;;  %s987_s23 = sphi %s1039_s23, %s1154_s23   ;;  %s983_s22 = sphi %s1037_s22, %s1153_s22   ;;  %s979_s21 = sphi %s1035_s21, %s1152_s21  }
   0x4   : > { %p29_p0 = scmp.ge.s32.totalorder %s28_s26, 4  ;;  %p843_p1 = scmp.ge.s32.totalorder %s995_s25, 1 }
   0x5   : > { %p304_p2 = scmp.lt.s32.totalorder %s995_s25, 9 }
   0x6   : > { %s1157_s26 = smov (%p29_p0, %s28_s26), 0  ;;  %s1159_s27 = smov (!%p29_p0, %s35_s27), %s991_s24 }
   0x7   : > { %p305_p3 = pnand %p843_p1, %p304_p2  ;;  %p37_p4 = scmp.ge.s32.totalorder %s1159_s27, 2 }
   0x8   : > { %p378_p5 = scmp.lt.s32.totalorder (!%p305_p3), %s983_s22, 1  ;;  %p380_p6 = scmp.lt.s32.totalorder (!%p305_p3), %s979_s21, 3 }
   0x9   : > { %s1161_s27 = smov (%p37_p4, %s1159_s27), 0  ;;  %308 = sbr.rel (%p305_p3) target bundleno = 963 (0x3c3), region = 44 }
   0xa   : > { %p858_p7 = scmp.ne.s32.totalorder (!%p305_p3), %s979_s21, 0 }
   0xe   : > { %s1163_s22 = smov (!%p378_p5, %s983_s22), 1 }
   0xf   : > { %s381_s28 = scalar_select %p380_p6, %s979_s21, 3 }
  0x10   : > { %s1069_s29 = sshll.u32 %s1163_s22, 3 }
  0x11   : > { %s844_s30 = sshll.u32 %s381_s28, 1  ;;  %s853_s7 = sshll.u32 %s381_s28, 2 }
  0x12   : > { %s387_s8 = sadd.s32 %s1069_s29, %s844_s30  ;;  %s1075_s11 = scalar_lea.vmem %s1148_s3, %s853_s7 }
  0x13   : > { %s1077_s12 = sshll.u32 %s387_s8, 2  ;;  %s421_s15 = scalar_lea.vmem %s1150_s5, %s1069_s29 }
  0x14   : > { %s389_s18 = scalar_lea.vmem %s1145_s0, %s1077_s12  ;;  %s399_s22 = scalar_lea.vmem %s1146_s1, %s1077_s12 }
  0x15   : > { %s408_s7 = scalar_lea.vmem %s1147_s2, %s1077_s12  ;;  %s1099_s10 = scalar_lea.vmem %s1151_s6, %s1069_s29 }
  0x16   : > { %437 = sbr.rel (%p858_p7) target bundleno = 29 (0x1d), region = 48 }
  0x1b   : > { %vm438_vm0 = vcmask 261120   ;;  %v997_v0 = vmov 0.0  }
  0x1c   : > { %439 = vst.msk [vmem:[#allocation2] sm:$0xff] %vm438_vm0, %v997_v0  ;;  %440 = vst.msk [vmem:[#allocation2 + $0x8] sm:$0xff] %vm438_vm0, %v997_v0 }
  0x1d PF: > { %v946_v1 = vld [vmem:[%s399_s22] sm:$0xff]   ;;  %v998_v2 = vmov 0.0   ;;  %vm455_vm1 = vcmask 64512   ;;  %vm999_vm2 = vmmov 0   ;;  %vm503_vm3 = vcmask 130048   ;;  %p865_p8 = scmp.ne.s32.totalorder %s979_s21, 3 }
  0x1e   : > { %885 = vmatprep.subr.bf16.mxu0 %v998_v2  ;;  %891 = vmatprep.subr.bf16.mxu1 %v998_v2  ;;  %v460_v3 = vsel %vm455_vm1, %v946_v1, 0  ;;  %v947_v4 = vld [vmem:[%s389_s18] sm:$0xff]   ;;  %vm586_vm4 = vcmask 1043456   ;;  %vm633_vm5 = vcmask 261120  }
  0x1f   : > { %887 = vmatprep.mubr.msk.bf16.mxu0 %vm999_vm2, %v998_v2  ;;  %893 = vmatprep.mubr.msk.bf16.mxu1 %vm999_vm2, %v998_v2  ;;  %v948_v21 = vld [vmem:[%s408_s7] sm:$0xff]  }
  0x20   : > { %886 = vmatpush3.bf16.xpose.msra.mxu0 %v460_v3  ;;  %892 = vmatpush3.bf16.msra.mxu1 %v948_v21  ;;  %v582_v26 = vld [vmem:[%s1075_s11] sm:$0xf] }
  0x21   : > { %897 = vmatprep.subr.bf16.mxu1 %v998_v2  ;;  %v588_v30 = vsel %vm586_vm4, %v582_v26, 0 }
  0x23   : > { %v579_v36 = vld [vmem:[#allocation2] sm:$0xff]  ;;  %v580_v40 = vld [vmem:[#allocation2 + $0x8] sm:$0xff] }
  0x27   : > { %888 = vmatmul.mubr.msk.bf16.vlgmr.msra.gmra.mxu0 %vm455_vm1, %v947_v4 }
  0xe7   : > { %v496_v5 = vpop.f32.mrf.mxu0 }
  0xe8   : > { %v504_v6 = vsel %vm503_vm3, %v496_v5, -inf }
  0xe9   : > { %505 = vmax.xlane.f32.xlu0 %v504_v6  ;;  %v889_v7 = vpop.f32.mrf.mxu0 }
  0xeb   : > { %v499_v8 = vpop.f32.mrf.mxu0 }
  0xec   : > { %v507_v9 = vsel %vm503_vm3, %v499_v8, -inf }
  0xed   : > { %508 = vmax.xlane.f32.xlu0 %v507_v9  ;;  %v890_v10 = vpop.f32.mrf.mxu0 }
 0x172   : > { %v506_v11 = vpop.xlane.xlu0 %505 }
 0x173   : > { %v510_v12 = vsub.f32 %v496_v5, %v506_v11 }
 0x175   : > { %v512_v13 = vmul.f32 1.442695, %v510_v12 }
 0x176   : > { %v509_v14 = vpop.xlane.xlu0 %508 }
 0x177   : > { %949 = vpow2.f32 %v512_v13  ;;  %v511_v15 = vsub.f32 %v499_v8, %v509_v14 }
 0x179   : > { %v514_v16 = vmul.f32 1.442695, %v511_v15 }
 0x17b   : > { %951 = vpow2.f32 %v514_v16 }
 0x184   : > { %v950_v17 = vpop.eup %949 }
 0x185   : > { %v516_v18 = vsel %vm503_vm3, %v950_v17, 0.0 }
 0x186   : > { %517 = vadd.xlane.f32.xlu1 %v516_v18 }
 0x188   : > { %v952_v19 = vpop.eup %951 }
 0x189   : > { %v519_v20 = vsel %vm503_vm3, %v952_v19, 0.0 }
 0x18a   : > { %520 = vadd.xlane.f32.xlu1 %v519_v20 }
 0x20f   : > { %v518_v22 = vpop.xlane.xlu1 %517 }
 0x210   : > { %953 = vrcp.f32 %v518_v22 }
 0x213   : > { %v521_v23 = vpop.xlane.xlu1 %520 }
 0x214   : > { %955 = vrcp.f32 %v521_v23 }
 0x21d   : > { %v954_v24 = vpop.eup %953 }
 0x21e   : > { %v524_v27 = vmul.f32 %v954_v24, %v950_v17 }
 0x221   : > { %v956_v25 = vpop.eup %955 }
 0x222   : > { %v525_v28 = vmul.f32 %v956_v25, %v952_v19 }
 0x224   : > { %v526_v29 = vpack.c.bf16 %v525_v28, %v524_v27 }
 0x226   : > { %894 = vmatmul.mubr.msk.bf16.vlgmr.msra.gmra.mxu1 %vm503_vm3, %v526_v29 }
 0x227   : > { %898 = vmatpush3.bf16.msra.mxu1 %v588_v30  ;;  %899 = vmatprep.mubr.msk.bf16.mxu1 %vm999_vm2, %v998_v2 }
 0x2e6   : > { %v572_v31 = vpop.f32.mrf.mxu1 }
 0x2e8   : > { %v895_v32 = vpop.f32.mrf.mxu1 }
 0x2ea   : > { %v575_v33 = vpop.f32.mrf.mxu1 }
 0x2eb   : > { %v581_v34 = vpack.c.bf16 %v575_v33, %v572_v31 }
 0x2ec   : > { %v896_v35 = vpop.f32.mrf.mxu1 }
 0x2ed   : > { %900 = vmatmul.mubr.msk.bf16.vlgmr.msra.gmra.mxu1 %vm455_vm1, %v581_v34 }
 0x3ad   : > { %v624_v37 = vpop.f32.mrf.mxu1 }
 0x3ae   : > { %v631_v38 = vadd.f32 %v624_v37, %v579_v36 }
 0x3af   : > { %v901_v39 = vpop.f32.mrf.mxu1 }
 0x3b0   : > { %634 = vst.msk [vmem:[#allocation2] sm:$0xff] %vm633_vm5, %v631_v38  ;;  %639 = sbr.rel (%p865_p8) target bundleno = 963 (0x3c3), region = 52 }
 0x3b1   : > { %v627_v41 = vpop.f32.mrf.mxu1 }
 0x3b2   : > { %v632_v42 = vadd.f32 %v627_v41, %v580_v40 }
 0x3b3   : > { %v902_v43 = vpop.f32.mrf.mxu1 }
 0x3b4   : > { %635 = vst.msk [vmem:[#allocation2 + $0x8] sm:$0xff] %vm633_vm5, %v632_v42 }
 0x3b5   : > { %v876_v44 = vld [vmem:[%s421_s15] sm:$0xff]   ;;  %vm665_vm6 = vcmask 257024  }
 0x3b6   : > { %v877_v46 = vunpack.c.l.bf16 %v876_v44  ;;  %v878_v47 = vunpack.c.h.bf16 %v876_v44  ;;  %v866_v49 = vld [vmem:[%s1149_s4] ss:$0 sm:$0xff] }
 0x3b7   : > { %v644_v45 = vld [vmem:[#allocation2] sm:$0xff] }
 0x3b8   : > { %v646_v50 = vadd.f32 %v877_v46, %v644_v45 }
 0x3ba   : > { %v655_v52 = vadd.f32 %v866_v49, %v646_v50 }
 0x3bb   : > { %v645_v48 = vld [vmem:[#allocation2 + $0x8] sm:$0xff] }
 0x3bc   : > { %v647_v51 = vadd.f32 %v878_v47, %v645_v48  ;;  %v873_v54 = vpack.c.bf16 %v655_v52, %v655_v52 }
 0x3be   : > { %v656_v53 = vadd.f32 %v866_v49, %v647_v51  ;;  %666 = vst.msk [vmem:[%s1099_s10] sm:$0xf] %vm665_vm6, %v873_v54 }
 0x3c0   : > { %v874_v55 = vpack.c.bf16 %v656_v53, %v656_v53 }
 0x3c2   : > { %667 = vst.msk [vmem:[%s1099_s10 + $0x4] sm:$0xf] %vm665_vm6, %v874_v55 }
 0x3c3 PF: > { %s16_s25 = sadd.s32 1, %s995_s25   ;;  %s1152_s21 = smov %s987_s23 }
 0x3c4   : > { %p13_p9 = scmp.ge.s32.totalorder %s16_s25, 10   ;;  %s1153_s22 = smov %s991_s24 }
 0x3c5   : > { %s1154_s23 = smov %s1157_s26  ;;  %s1155_s24 = smov %s1161_s27 }
 0x3c6   :  { %15 = sbr.rel (!%p13_p9) target bundleno = 3 (0x3), region = 94 }

// kernel: vit_forward.15
= control target key start
LH: loop header
LB: loop body
LE: loop exit
PB: predicated region body
PF: predicated region fallthrough
CT: control target
= control target key end

     0   :  { %vm26_vm0 = vcmask 254976   ;;  %s238_s0 = inlined_call_operand.vmem [shape: bf16[2,32], index: 0, kind: input, shape index: {}]   ;;  %s239_s1 = inlined_call_operand.vmem [shape: f32[1,32], index: 1, kind: input, shape index: {}]   ;;  %s240_s2 = inlined_call_operand.vmem [shape: f32[1,32], index: 2, kind: input, shape index: {}]   ;;  %s241_s3 = inlined_call_operand.vmem [shape: bf16[32,128], index: 3, kind: input, shape index: {}]   ;;  %s242_s4 = inlined_call_operand.vmem [shape: f32[1,128], index: 4, kind: input, shape index: {}]   ;;  %s243_s5 = inlined_call_operand.hbm [shape: f32[2,128], index: 5, kind: output, shape index: {}]  }
   0x1   :  { %v22_v0 = vld [vmem:[%s238_s0] sm:$0x1] }
   0x2   :  { %v23_v1 = vunpack.c.l.bf16 %v22_v0 }
   0x3   :  { %10 = vsyncpa [#allocation3], 0  ;;  %v158_v8 = vld [vmem:[%s241_s3 + $0x8] sm:$0xff]   ;;  %v184_v9 = vmov 0.0   ;;  %vm185_vm1 = vmmov 0   ;;  %v159_v10 = vld [vmem:[%s241_s3] sm:$0xff]  }
   0x4   :  { %v27_v2 = vsel %vm26_vm0, %v23_v1, 0.0  ;;  %147 = vmatprep.subr.bf16.mxu0 %v184_v9  ;;  %151 = vmatprep.mubr.msk.bf16.mxu0 %vm185_vm1, %v184_v9  ;;  %v138_v15 = vld [vmem:[%s239_s1] ss:$0 sm:$0xff]  ;;  %vm79_vm2 = vcmask 261120   ;;  %s186_s28 = smov [#allocation2]  }
   0x5   :  { %28 = vadd.xlane.f32.xlu0 %v27_v2  ;;  %148 = vmatpush3.bf16.msra.mxu0 %v158_v8  ;;  %v139_v17 = vld [vmem:[%s240_s2] ss:$0 sm:$0xff]  ;;  %s130_s29 = sshll.u32 %s186_s28, 4  ;;  %s131_s29 = int_to_ptr.vmem [resolvable:$true] %s130_s29 }
   0x6   :  { %149 = vmatprep.subr.bf16.mxu0 %v184_v9  ;;  %v140_v21 = vld [vmem:[%s242_s4] ss:$0 sm:$0xff]  ;;  %s162_s1 = scalar_lea.vmem %s131_s29, 32  ;;  %p167_p1 = scmp.lt.s32.totalorder %s131_s29, %s131_s29 }
   0x7   :  { %p163_p0 = scmp.ne.s32.totalorder %s131_s29, %s162_s1  ;;  %p168_p2 = scmp.lt.s32.totalorder %s162_s1, %s162_s1 }
   0x9   :  { %150 = vmatpush3.bf16.msra.mxu0 %v159_v10  ;;  %p169_p3 = por %p168_p2, %p167_p1 }
   0xb   :  { %p170_p4 = pnand %p169_p3, %p163_p0 }
  0x8e   :  { %v29_v3 = vpop.xlane.xlu0 %28 }
  0x8f   :  { %v31_v4 = vmul.f32 0.03125, %v29_v3 }
  0x91   :  { %v32_v5 = vsub.f32 %v23_v1, %v31_v4 }
  0x93   :  { %v33_v6 = vmul.f32 %v32_v5, %v32_v5 }
  0x95   :  { %v34_v7 = vsel %vm26_vm0, %v33_v6, 0.0 }
  0x96   :  { %35 = vadd.xlane.f32.xlu0 %v34_v7 }
 0x11f   :  { %v36_v11 = vpop.xlane.xlu0 %35 }
 0x120   :  { %v37_v12 = vmul.f32 0.03125, %v36_v11 }
 0x122   :  { %v38_v13 = vadd.f32 1e-05, %v37_v12 }
 0x124   :  { %160 = vrsqrt.f32 %v38_v13 }
 0x131   :  { %v161_v14 = vpop.eup %160 }
 0x132   :  { %v40_v16 = vmul.f32 %v161_v14, %v32_v5 }
 0x134   :  { %v47_v18 = vmul.f32 %v138_v15, %v40_v16 }
 0x136   :  { %v54_v19 = vadd.f32 %v139_v17, %v47_v18 }
 0x138   :  { %v55_v20 = vpack.c.bf16 %v54_v19, %v54_v19 }
 0x13a   :  { %152 = vmatmul.mubr.msk.bf16.vlgmr.msra.gmra.mxu0 %vm79_vm2, %v55_v20 }
 0x1fa   :  { %v117_v22 = vpop.f32.mrf.mxu0 }
 0x1fb   :  { %v118_v23 = vadd.f32 %v140_v21, %v117_v22 }
 0x1fc   :  { %v153_v24 = vpop.f32.mrf.mxu0 }
 0x1fd   :  { %123 = vst [vmem:[#allocation2] sm:$0x3] %v118_v23 }
 0x1fe   :  { %v120_v25 = vpop.f32.mrf.mxu0 }
 0x1ff   :  { %173 = shalt.err (!%p170_p4)
}
 0x200   :  { %133 = dma.vmem_to_hbm [thread:$0]  %s131_s29, 32, %s243_s5, [#allocation3]   ;;  %v154_v26 = vpop.f32.mrf.mxu0 }
 0x201   :  { %182 = dma.done.wait [#allocation3], 32  }
 0x202   :  { %183 = vsyncadd [#allocation3], 4294967264 }
 0x203   :  { %137 = vsyncpa [#allocation3], 1 }

// kernel: vit_forward.11
= control target key start
LH: loop header
LB: loop body
LE: loop exit
PB: predicated region body
PF: predicated region fallthrough
CT: control target
= control target key end

     0   :  { %s1013_s24 = smov 0   ;;  %s1015_s25 = smov 0   ;;  %s1118_s0 = inlined_call_operand.vmem [shape: bf16[2,16,32], index: 0, kind: input, shape index: {}]   ;;  %s1119_s1 = inlined_call_operand.vmem [shape: f32[1,32], index: 1, kind: input, shape index: {}]   ;;  %s1120_s2 = inlined_call_operand.vmem [shape: f32[1,32], index: 2, kind: input, shape index: {}]   ;;  %s1121_s3 = inlined_call_operand.vmem [shape: bf16[32,128], index: 3, kind: input, shape index: {}]   ;;  %s1122_s4 = inlined_call_operand.vmem [shape: f32[1,128], index: 4, kind: input, shape index: {}]   ;;  %s1123_s5 = inlined_call_operand.vmem [shape: bf16[128,32], index: 5, kind: input, shape index: {}]   ;;  %s1124_s6 = inlined_call_operand.vmem [shape: f32[1,32], index: 6, kind: input, shape index: {}]   ;;  %s1125_s7 = inlined_call_operand.vmem [shape: bf16[2,16,32], index: 7, kind: output, shape index: {}]  }
   0x1   :  { %s1017_s26 = smov 0  }
   0x2 LB: > { %s36_s27 = sadd.s32 1, %s965_s25  ;;  %p821_p0 = scmp.ge.s32.totalorder %s969_s26, 1  ;;  %s969_s26 = sphi %s1017_s26, %s17_s26   ;;  %s965_s25 = sphi %s1015_s25, %s1127_s25   ;;  %s961_s24 = sphi %s1013_s24, %s1126_s24  }
   0x3   : > { %p38_p1 = scmp.ge.s32.totalorder %s36_s27, 2  ;;  %p293_p2 = scmp.lt.s32.totalorder %s969_s26, 3 }
   0x5   : > { %s1129_s27 = smov (%p38_p1, %s36_s27), 0  ;;  %p294_p3 = pnand %p821_p0, %p293_p2 }
   0x6   : > { %p346_p4 = scmp.lt.s32.totalorder (!%p294_p3), %s961_s24, 1 }
   0x7   : > { %297 = sbr.rel (%p294_p3) target bundleno = 783 (0x30f), region = 48 }
   0xc   : > { %s1131_s24 = smov (!%p346_p4, %s961_s24), 1  ;;  %vm389_vm0 = vcmask 261120   ;;  %v928_v15 = vld [vmem:[%s1121_s3 + $0x8] sm:$0xff]   ;;  %v971_v16 = vmov 0.0   ;;  %vm972_vm1 = vmmov 0   ;;  %v929_v17 = vld [vmem:[%s1121_s3] sm:$0xff]  }
   0xd   : > { %s848_s28 = sshll.u32 %s1131_s24, 3  ;;  %874 = vmatprep.subr.bf16.mxu0 %v971_v16  ;;  %444 = vst.msk [vmem:[#allocation3] sm:$0xff] %vm389_vm0, %v971_v16  ;;  %445 = vst.msk [vmem:[#allocation3 + $0x8] sm:$0xff] %vm389_vm0, %v971_v16  ;;  %878 = vmatprep.mubr.msk.bf16.mxu0 %vm972_vm1, %v971_v16  ;;  %v826_v25 = vld [vmem:[%s1119_s1] ss:$0 sm:$0xff]  ;;  %vm441_vm2 = vcmask 257024  }
   0xe   : > { %s353_s8 = scalar_lea.vmem %s1118_s0, %s848_s28  ;;  %875 = vmatpush3.bf16.msra.mxu0 %v928_v15  ;;  %882 = vmatprep.subr.bf16.mxu1 %v971_v16  ;;  %v827_v27 = vld [vmem:[%s1120_s2] ss:$0 sm:$0xff]  ;;  %v931_v37 = vld [vmem:[%s1123_s5 + $0x38] sm:$0xff]   ;;  %v932_v38 = vld [vmem:[%s1123_s5 + $0x30] sm:$0xff]   ;;  %s376_s21 = scalar_lea.vmem %s1125_s7, %s848_s28 }
   0xf   : > { %v855_v0 = vld [vmem:[%s353_s8] sm:$0xff]   ;;  %876 = vmatprep.subr.bf16.mxu0 %v971_v16  ;;  %898 = vmatprep.mubr.msk.bf16.mxu1 %vm972_vm1, %v971_v16  ;;  %v933_v39 = vld [vmem:[%s1123_s5 + $0x28] sm:$0xff]   ;;  %v935_v41 = vld [vmem:[%s1123_s5 + $0x18] sm:$0xff]  }
  0x10   : > { %v1039_v1 = vunpack.c.l.bf16 %v855_v0  ;;  %v1041_v2 = vunpack.c.h.bf16 %v855_v0  ;;  %883 = vmatpush3.bf16.msra.mxu1 %v931_v37  ;;  %v934_v40 = vld [vmem:[%s1123_s5 + $0x20] sm:$0xff]   ;;  %v936_v42 = vld [vmem:[%s1123_s5 + $0x10] sm:$0xff]   ;;  %v937_v43 = vld [vmem:[%s1123_s5 + $0x8] sm:$0xff]  }
  0x11   : > { %884 = vmatprep.subr.bf16.mxu1 %v971_v16  ;;  %v938_v44 = vld [vmem:[%s1123_s5] sm:$0xff]  }
  0x12   : > { %v390_v3 = vsel %vm389_vm0, %v1039_v1, 0.0  ;;  %v393_v4 = vsel %vm389_vm0, %v1041_v2, 0.0  ;;  %877 = vmatpush3.bf16.msra.mxu0 %v929_v17  ;;  %v830_v45 = vld [vmem:[%s1122_s4] ss:$0 sm:$0xff] }
  0x13   : > { %391 = vadd.xlane.f32.xlu0 %v390_v3 }
  0x14   : > { %885 = vmatpush3.bf16.msra.mxu1 %v932_v38 }
  0x15   : > { %886 = vmatprep.subr.bf16.mxu1 %v971_v16 }
  0x17   : > { %394 = vadd.xlane.f32.xlu0 %v393_v4 }
  0x18   : > { %887 = vmatpush3.bf16.msra.mxu1 %v933_v39 }
  0x19   : > { %888 = vmatprep.subr.bf16.mxu1 %v971_v16 }
  0x1c   : > { %889 = vmatpush3.bf16.msra.mxu1 %v934_v40 }
  0x1d   : > { %890 = vmatprep.subr.bf16.mxu1 %v971_v16 }
  0x20   : > { %891 = vmatpush3.bf16.msra.mxu1 %v935_v41 }
  0x21   : > { %892 = vmatprep.subr.bf16.mxu1 %v971_v16 }
  0x24   : > { %893 = vmatpush3.bf16.msra.mxu1 %v936_v42 }
  0x25   : > { %894 = vmatprep.subr.bf16.mxu1 %v971_v16 }
  0x28   : > { %895 = vmatpush3.bf16.msra.mxu1 %v937_v43 }
  0x29   : > { %896 = vmatprep.subr.bf16.mxu1 %v971_v16 }
  0x2c   : > { %897 = vmatpush3.bf16.msra.mxu1 %v938_v44 }
  0x9c   : > { %v392_v5 = vpop.xlane.xlu0 %391 }
  0x9d   : > { %v397_v6 = vmul.f32 0.03125, %v392_v5 }
  0x9f   : > { %v399_v7 = vsub.f32 %v1039_v1, %v397_v6 }
  0xa0   : > { %v395_v8 = vpop.xlane.xlu0 %394 }
  0xa1   : > { %v398_v9 = vmul.f32 0.03125, %v395_v8  ;;  %v401_v10 = vmul.f32 %v399_v7, %v399_v7 }
  0xa3   : > { %v400_v11 = vsub.f32 %v1041_v2, %v398_v9  ;;  %v403_v12 = vsel %vm389_vm0, %v401_v10, 0.0  ;;  %v539_v9 = vld [vmem:[#allocation3] sm:$0xff] }
  0xa4   : > { %404 = vadd.xlane.f32.xlu1 %v403_v12 }
  0xa5   : > { %v402_v13 = vmul.f32 %v400_v11, %v400_v11 }
  0xa7   : > { %v406_v14 = vsel %vm389_vm0, %v402_v13, 0.0  ;;  %v540_v13 = vld [vmem:[#allocation3 + $0x8] sm:$0xff] }
  0xa8   : > { %407 = vadd.xlane.f32.xlu1 %v406_v14 }
 0x12d   : > { %v405_v18 = vpop.xlane.xlu1 %404 }
 0x12e   : > { %v409_v19 = vmul.f32 0.03125, %v405_v18  ;;  %v843_v18 = vld [vmem:[%s1124_s6] ss:$0 sm:$0xff] }
 0x130   : > { %v411_v20 = vadd.f32 1e-05, %v409_v19 }
 0x131   : > { %v408_v21 = vpop.xlane.xlu1 %407 }
 0x132   : > { %939 = vrsqrt.f32 %v411_v20  ;;  %v410_v22 = vmul.f32 0.03125, %v408_v21 }
 0x134   : > { %v412_v23 = vadd.f32 1e-05, %v410_v22 }
 0x136   : > { %941 = vrsqrt.f32 %v412_v23 }
 0x13f   : > { %v940_v24 = vpop.eup %939 }
 0x140   : > { %v415_v26 = vmul.f32 %v940_v24, %v399_v7 }
 0x142   : > { %v423_v28 = vmul.f32 %v826_v25, %v415_v26 }
 0x143   : > { %v942_v29 = vpop.eup %941 }
 0x144   : > { %v431_v30 = vadd.f32 %v827_v27, %v423_v28  ;;  %v416_v31 = vmul.f32 %v942_v29, %v400_v11 }
 0x146   : > { %v850_v32 = vpack.c.bf16 %v431_v30, %v431_v30  ;;  %v424_v33 = vmul.f32 %v826_v25, %v416_v31 }
 0x148   : > { %442 = vst.msk [vmem:[#allocation2] sm:$0xf] %vm441_vm2, %v850_v32  ;;  %v432_v34 = vadd.f32 %v827_v27, %v424_v33 }
 0x14a   : > { %v851_v35 = vpack.c.bf16 %v432_v34, %v432_v34 }
 0x14c   : > { %443 = vst.msk [vmem:[#allocation2 + $0x4] sm:$0xf] %vm441_vm2, %v851_v35 }
 0x153   : > { %v930_v36 = vld [vmem:[#allocation2] sm:$0xff]  }
 0x154   : > { %879 = vmatmul.mubr.msk.bf16.vlgmr.msra.gmra.mxu0 %vm389_vm0, %v930_v36 }
 0x214   : > { %v514_v46 = vpop.f32.mrf.mxu0 }
 0x215   : > { %v515_v47 = vadd.f32 %v830_v45, %v514_v46 }
 0x216   : > { %v880_v48 = vpop.f32.mrf.mxu0 }
 0x217   : > { %v523_v49 = vmul.f32 0.044715, %v515_v47  ;;  %v521_v3 = vmul.f32 0.5, %v515_v47 }
 0x218   : > { %v517_v50 = vpop.f32.mrf.mxu0 }
 0x219   : > { %v525_v51 = vmul.f32 %v523_v49, %v515_v47  ;;  %v518_v52 = vadd.f32 %v830_v45, %v517_v50 }
 0x21a   : > { %v881_v53 = vpop.f32.mrf.mxu0 }
 0x21b   : > { %v527_v54 = vmul.f32 %v525_v51, %v515_v47  ;;  %v524_v55 = vmul.f32 0.044715, %v518_v52  ;;  %v522_v4 = vmul.f32 0.5, %v518_v52 }
 0x21d   : > { %v526_v56 = vmul.f32 %v524_v55, %v518_v52  ;;  %v529_v57 = vadd.f32 %v527_v54, %v515_v47 }
 0x21f   : > { %v528_v58 = vmul.f32 %v526_v56, %v518_v52  ;;  %v531_v59 = vmul.f32 0.7978846, %v529_v57 }
 0x221   : > { %v530_v60 = vadd.f32 %v528_v58, %v518_v52  ;;  %943 = vtanh.f32 %v531_v59 }
 0x223   : > { %v532_v61 = vmul.f32 0.7978846, %v530_v60 }
 0x225   : > { %945 = vtanh.f32 %v532_v61 }
 0x22e   : > { %v944_v62 = vpop.eup %943 }
 0x22f   : > { %v535_v63 = vadd.f32 1.0, %v944_v62 }
 0x231   : > { %v537_v6 = vmul.f32 %v535_v63, %v521_v3 }
 0x232   : > { %v946_v0 = vpop.eup %945 }
 0x233   : > { %v536_v5 = vadd.f32 1.0, %v946_v0 }
 0x235   : > { %v538_v7 = vmul.f32 %v536_v5, %v522_v4 }
 0x237   : > { %v541_v8 = vpack.c.bf16 %v538_v7, %v537_v6 }
 0x239   : > { %899 = vmatmul.mubr.bf16.vlgmr.msra.gmra.mxu1 %v541_v8 }
 0x2f9   : > { %v640_v10 = vpop.f32.mrf.mxu1 }
 0x2fa   : > { %v647_v11 = vadd.f32 %v640_v10, %v539_v9 }
 0x2fb   : > { %v900_v12 = vpop.f32.mrf.mxu1 }
 0x2fc   : > { %649 = vst.msk [vmem:[#allocation3] sm:$0xff] %vm389_vm0, %v647_v11 }
 0x2fd   : > { %v643_v14 = vpop.f32.mrf.mxu1 }
 0x2fe   : > { %v648_v15 = vadd.f32 %v643_v14, %v540_v13 }
 0x2ff   : > { %v901_v16 = vpop.f32.mrf.mxu1 }
 0x300   : > { %650 = vst.msk [vmem:[#allocation3 + $0x8] sm:$0xff] %vm389_vm0, %v648_v15 }
 0x303   : > { %v658_v17 = vld [vmem:[#allocation3] sm:$0xff] }
 0x304   : > { %v660_v19 = vadd.f32 %v1039_v1, %v658_v17 }
 0x306   : > { %v669_v20 = vadd.f32 %v843_v18, %v660_v19 }
 0x307   : > { %v659_v21 = vld [vmem:[#allocation3 + $0x8] sm:$0xff] }
 0x308   : > { %v852_v22 = vpack.c.bf16 %v669_v20, %v669_v20  ;;  %v661_v23 = vadd.f32 %v1041_v2, %v659_v21 }
 0x30a   : > { %680 = vst.msk [vmem:[%s376_s21] sm:$0xf] %vm441_vm2, %v852_v22  ;;  %v670_v24 = vadd.f32 %v843_v18, %v661_v23 }
 0x30c   : > { %v853_v25 = vpack.c.bf16 %v670_v24, %v670_v24 }
 0x30e   : > { %681 = vst.msk [vmem:[%s376_s21 + $0x4] sm:$0xf] %vm441_vm2, %v853_v25 }
 0x30f PF: > { %s17_s26 = sadd.s32 1, %s969_s26   ;;  %s1126_s24 = smov %s965_s25 }
 0x310   : > { %p14_p5 = scmp.ge.s32.totalorder %s17_s26, 4   ;;  %s1127_s25 = smov %s1129_s27 }
 0x312   :  { %16 = sbr.rel (!%p14_p5) target bundleno = 2 (0x2), region = 95 }

</bundles_post_ra>
